<compile_context>
chip_gen: v7x
topology: tpu7x:2x2x1
jax: 0.10.0
libtpu: 0.0.40
codegen_flags: <defaults>
</compile_context>

<pallas_src>
import math

import jax
import jax.numpy as jnp
from jax import lax
from jax.experimental import pallas as pl
from jax.experimental.pallas import tpu as pltpu

KERNEL_SIZE = 5
RADIUS = (KERNEL_SIZE - 1) // 2
STRIDE = 1
PADDING = 4
CHANNELS = 3

# The roll-based "full correlation" formulation below relies on these; a silent
# change of kernel_size/stride/padding would otherwise corrupt plane edges.
assert STRIDE == 1
assert KERNEL_SIZE % 2 == 1
assert PADDING == KERNEL_SIZE - 1
assert PADDING >= RADIUS >= 1


def _taps_1d(kernel_size: int = KERNEL_SIZE) -> tuple:
    """1-D separable taps; outer(taps, taps) == the module's normalized 2-D kernel."""
    mean = (kernel_size - 1) / 2.0
    variance = (kernel_size / 6.0) ** 2.0
    t = [math.exp(-((i - mean) ** 2) / (2.0 * variance)) for i in range(kernel_size)]
    s = sum(t)
    t = tuple(ti / s for ti in t)
    assert all(abs(t[i] - t[kernel_size - 1 - i]) < 1e-15 for i in range(kernel_size))
    return t


def _num_tensorcores() -> int:
    """Best-effort TensorCore-per-device count (v7x: 2; v5e/v6e: 1)."""
    try:
        dev = jax.devices()[0]
        for attr in ("num_cores", "core_count"):
            v = getattr(dev, attr, None)
            if isinstance(v, int) and v > 0:
                return v
    except Exception:
        pass
    try:
        info = pltpu.get_tpu_info()
        for attr in ("num_cores", "tensorcores_per_chip", "num_tensorcores"):
            v = getattr(info, attr, None)
            if isinstance(v, int) and v > 0:
                return v
    except Exception:
        pass
    return 1


def gaussian_filter(x: jnp.ndarray) -> jnp.ndarray:
    """Depthwise 5x5 Gaussian blur, stride=1, padding=4. x: (N, C, H, W), float dtype."""
    assert jnp.issubdtype(x.dtype, jnp.floating), x.dtype
    n, c, h, w = x.shape
    taps = _taps_1d()

    h_out = (h + 2 * PADDING - KERNEL_SIZE) // STRIDE + 1     # = h + 4
    w_out = (w + 2 * PADDING - KERNEL_SIZE) // STRIDE + 1     # = w + 4

    # Per-plane working slab: sublanes rounded to 8, lanes rounded to 128, with the
    # plane embedded at offset (RADIUS, RADIUS) and zeros elsewhere.
    subh = ((h_out + 7) // 8) * 8
    lanes = ((w_out + 127) // 128) * 128
    # Zero margins so every +/-RADIUS roll wrap-around only touches zeros.
    assert subh - (RADIUS + h) >= RADIUS
    assert lanes - (RADIUS + w) >= RADIUS

    b = n * c
    num_tc = _num_tensorcores()
    g = 2 if (num_tc >= 2 and b % 2 == 0) else 1              # 1 grid step on v5e/v6e
    p = b // g

    t_mid = taps[RADIUS]
    t_off = tuple(taps[RADIUS + d] for d in range(1, RADIUS + 1))

    def kernel(x_ref, o_ref):
        # x_ref: (p, h, w)   o_ref: (p, h_out, w_out)
        for pi in range(p):
            xp = x_ref[pi].astype(jnp.float32)                          # (h, w)

            # Build the padded slab as a register value (no VMEM scratch).
            xl = jnp.concatenate(
                [jnp.zeros((h, RADIUS), jnp.float32),
                 xp,
                 jnp.zeros((h, lanes - RADIUS - w), jnp.float32)], axis=1)   # (h, lanes)
            slab = jnp.concatenate(
                [jnp.zeros((RADIUS, lanes), jnp.float32),
                 xl,
                 jnp.zeros((subh - RADIUS - h, lanes), jnp.float32)], axis=0)  # (subh, lanes)

            # Vertical (sublane) 5-tap pass: roll(d) + roll(N-d) is the {+d, -d}
            # shift pair regardless of roll direction; symmetric taps make the
            # fold exact and wrap-around only ever reads the zero margins.
            col = t_mid * slab
            for d in range(1, RADIUS + 1):
                pair = (pltpu.roll(slab, d, axis=0) +
                        pltpu.roll(slab, subh - d, axis=0))
                col = col + t_off[d - 1] * pair                         # (subh, lanes)

            # Horizontal (lane) 5-tap pass.
            row = t_mid * col
            for d in range(1, RADIUS + 1):
                pair = (pltpu.roll(col, d, axis=1) +
                        pltpu.roll(col, lanes - d, axis=1))
                row = row + t_off[d - 1] * pair                         # (subh, lanes)

            o_ref[pi] = row[:h_out, :w_out].astype(o_ref.dtype)

    itemsize = jnp.dtype(x.dtype).itemsize
    cost = pl.CostEstimate(
        flops=14 * b * subh * lanes,
        transcendentals=0,
        bytes_accessed=b * h * w * itemsize + b * h_out * w_out * itemsize,
    )

    x_g = x.reshape(g, p, h, w)
    out = pl.pallas_call(
        kernel,
        out_shape=jax.ShapeDtypeStruct((g, p, h_out, w_out), x.dtype),
        grid=(g,),
        in_specs=[pl.BlockSpec((None, p, h, w), lambda i: (i, 0, 0, 0))],
        out_specs=pl.BlockSpec((None, p, h_out, w_out), lambda i: (i, 0, 0, 0)),
        compiler_params=pltpu.CompilerParams(dimension_semantics=("parallel",)),
        cost_estimate=cost,
    )(x_g)

    # Plane order is preserved -> unpack is a pure (free) reshape, no transpose.
    return out.reshape(n, c, h_out, w_out)


def _reference(x: jnp.ndarray) -> jnp.ndarray:
    """Pure-JAX reference matching torch.nn.Conv2d(3,3,5,1,4,groups=3) with the module's weights."""
    k = KERNEL_SIZE
    mean = (k - 1) / 2.0
    variance = (k / 6.0) ** 2.0
    coords = jnp.arange(k, dtype=jnp.float32)
    x_grid = jnp.tile(coords, (k,)).reshape(k, k)
    y_grid = x_grid.T
    xy_grid = jnp.stack([x_grid, y_grid], axis=-1)
    gk = jnp.exp(-jnp.sum((xy_grid - mean) ** 2.0, axis=-1) / (2.0 * variance))
    gk = gk / jnp.sum(gk)
    w4 = jnp.broadcast_to(gk[None, None], (x.shape[1], 1, k, k))
    return lax.conv_general_dilated(
        x, w4,
        window_strides=(STRIDE, STRIDE),
        padding=[(PADDING, PADDING), (PADDING, PADDING)],
        dimension_numbers=("NCHW", "OIHW", "NCHW"),
        feature_group_count=x.shape[1],
        precision=lax.Precision.HIGHEST,
    )


if __name__ == "__main__":
    key = jax.random.PRNGKey(0)
    x = jax.random.normal(key, (2, CHANNELS, 16, 16), dtype=jnp.float32)

    y = jax.block_until_ready(gaussian_filter(x))
    y_ref = _reference(x)

    assert y.shape == y_ref.shape == (2, 3, 20, 20), (y.shape, y_ref.shape)
    max_err = float(jnp.max(jnp.abs(y - y_ref)))
    assert max_err < 1e-5, f"mismatch vs reference: {max_err}"

    print("KERNEL_OK")
</pallas_src>

<mosaic_0001>
module attributes {stable_mosaic.version = 11 : i64} {
  func.func @kernel(%arg0: i32, %arg1: memref<1x6x16x16xf32, #tpu.memory_space<vmem>>, %arg2: memref<1x6x20x20xf32, #tpu.memory_space<vmem>>) attributes {dimension_semantics = [#tpu.dimension_semantics<parallel>], iteration_bounds = array<i64: 1>, scalar_prefetch = 0 : i64, scratch_operands = 0 : i64, tpu.core_type = #tpu.core_type<tc>, window_params = [{transform_indices = @transform_0, window_bounds = array<i64: 1, 6, 16, 16>}, {transform_indices = @transform_1, window_bounds = array<i64: 1, 6, 20, 20>}]} {
    %c0 = arith.constant 0 : index
    %c0_0 = arith.constant 0 : index
    %c0_1 = arith.constant 0 : index
    %c0_2 = arith.constant 0 : index
    %0 = vector.load %arg1[%c0, %c0_0, %c0_1, %c0_2] : memref<1x6x16x16xf32, #tpu.memory_space<vmem>>, vector<1x1x16x16xf32>
    %1 = vector.shape_cast %0 : vector<1x1x16x16xf32> to vector<16x16xf32>
    %cst = arith.constant 0.000000e+00 : f32
    %2 = vector.broadcast %cst : f32 to vector<16x2xf32>
    %cst_3 = arith.constant 0.000000e+00 : f32
    %3 = vector.broadcast %cst_3 : f32 to vector<16x110xf32>
    %4 = tpu.concatenate %2, %1, %3 in 1 : vector<16x2xf32>, vector<16x16xf32>, vector<16x110xf32> -> vector<16x128xf32>
    %cst_4 = arith.constant 0.000000e+00 : f32
    %5 = vector.broadcast %cst_4 : f32 to vector<2x128xf32>
    %cst_5 = arith.constant 0.000000e+00 : f32
    %6 = vector.broadcast %cst_5 : f32 to vector<6x128xf32>
    %7 = tpu.concatenate %5, %4, %6 in 0 : vector<2x128xf32>, vector<16x128xf32>, vector<6x128xf32> -> vector<24x128xf32>
    %cst_6 = arith.constant 0.479438305 : f32
    %8 = vector.broadcast %cst_6 : f32 to vector<24x128xf32>
    %9 = arith.mulf %8, %7 : vector<24x128xf32>
    %c1_i32 = arith.constant 1 : i32
    %10 = tpu.dynamic_rotate %7 by %c1_i32 dim 0 : vector<24x128xf32>, i32 -> vector<24x128xf32>
    %c23_i32 = arith.constant 23 : i32
    %11 = tpu.dynamic_rotate %7 by %c23_i32 dim 0 : vector<24x128xf32>, i32 -> vector<24x128xf32>
    %12 = arith.addf %10, %11 : vector<24x128xf32>
    %cst_7 = arith.constant 0.233367682 : f32
    %13 = vector.broadcast %cst_7 : f32 to vector<24x128xf32>
    %14 = arith.mulf %13, %12 : vector<24x128xf32>
    %15 = arith.addf %9, %14 : vector<24x128xf32>
    %c2_i32 = arith.constant 2 : i32
    %16 = tpu.dynamic_rotate %7 by %c2_i32 dim 0 : vector<24x128xf32>, i32 -> vector<24x128xf32>
    %c22_i32 = arith.constant 22 : i32
    %17 = tpu.dynamic_rotate %7 by %c22_i32 dim 0 : vector<24x128xf32>, i32 -> vector<24x128xf32>
    %18 = arith.addf %16, %17 : vector<24x128xf32>
    %cst_8 = arith.constant 0.0269131567 : f32
    %19 = vector.broadcast %cst_8 : f32 to vector<24x128xf32>
    %20 = arith.mulf %19, %18 : vector<24x128xf32>
    %21 = arith.addf %15, %20 : vector<24x128xf32>
    %cst_9 = arith.constant 0.479438305 : f32
    %22 = vector.broadcast %cst_9 : f32 to vector<24x128xf32>
    %23 = arith.mulf %22, %21 : vector<24x128xf32>
    %c1_i32_10 = arith.constant 1 : i32
    %24 = tpu.dynamic_rotate %21 by %c1_i32_10 dim 1 : vector<24x128xf32>, i32 -> vector<24x128xf32>
    %c127_i32 = arith.constant 127 : i32
    %25 = tpu.dynamic_rotate %21 by %c127_i32 dim 1 : vector<24x128xf32>, i32 -> vector<24x128xf32>
    %26 = arith.addf %24, %25 : vector<24x128xf32>
    %cst_11 = arith.constant 0.233367682 : f32
    %27 = vector.broadcast %cst_11 : f32 to vector<24x128xf32>
    %28 = arith.mulf %27, %26 : vector<24x128xf32>
    %29 = arith.addf %23, %28 : vector<24x128xf32>
    %c2_i32_12 = arith.constant 2 : i32
    %30 = tpu.dynamic_rotate %21 by %c2_i32_12 dim 1 : vector<24x128xf32>, i32 -> vector<24x128xf32>
    %c126_i32 = arith.constant 126 : i32
    %31 = tpu.dynamic_rotate %21 by %c126_i32 dim 1 : vector<24x128xf32>, i32 -> vector<24x128xf32>
    %32 = arith.addf %30, %31 : vector<24x128xf32>
    %cst_13 = arith.constant 0.0269131567 : f32
    %33 = vector.broadcast %cst_13 : f32 to vector<24x128xf32>
    %34 = arith.mulf %33, %32 : vector<24x128xf32>
    %35 = arith.addf %29, %34 : vector<24x128xf32>
    %36 = vector.extract_strided_slice %35 {offsets = [0, 0], sizes = [20, 20], strides = [1, 1]} : vector<24x128xf32> to vector<20x20xf32>
    %c0_14 = arith.constant 0 : index
    %c0_15 = arith.constant 0 : index
    %c0_16 = arith.constant 0 : index
    %c0_17 = arith.constant 0 : index
    %37 = vector.load %arg2[%c0_14, %c0_15, %c0_16, %c0_17] : memref<1x6x20x20xf32, #tpu.memory_space<vmem>>, vector<1x1x20x20xf32>
    %38 = vector.shape_cast %37 : vector<1x1x20x20xf32> to vector<20x20xf32>
    %39 = vector.shape_cast %36 : vector<20x20xf32> to vector<1x1x20x20xf32>
    tpu.vector_store %arg2[%c0_14, %c0_15, %c0_16, %c0_17], %39 {strides = array<i32>} : memref<1x6x20x20xf32, #tpu.memory_space<vmem>>, vector<1x1x20x20xf32>,
    %c0_18 = arith.constant 0 : index
    %c1 = arith.constant 1 : index
    %c0_19 = arith.constant 0 : index
    %c0_20 = arith.constant 0 : index
    %40 = vector.load %arg1[%c0_18, %c1, %c0_19, %c0_20] : memref<1x6x16x16xf32, #tpu.memory_space<vmem>>, vector<1x1x16x16xf32>
    %41 = vector.shape_cast %40 : vector<1x1x16x16xf32> to vector<16x16xf32>
    %cst_21 = arith.constant 0.000000e+00 : f32
    %42 = vector.broadcast %cst_21 : f32 to vector<16x2xf32>
    %cst_22 = arith.constant 0.000000e+00 : f32
    %43 = vector.broadcast %cst_22 : f32 to vector<16x110xf32>
    %44 = tpu.concatenate %42, %41, %43 in 1 : vector<16x2xf32>, vector<16x16xf32>, vector<16x110xf32> -> vector<16x128xf32>
    %cst_23 = arith.constant 0.000000e+00 : f32
    %45 = vector.broadcast %cst_23 : f32 to vector<2x128xf32>
    %cst_24 = arith.constant 0.000000e+00 : f32
    %46 = vector.broadcast %cst_24 : f32 to vector<6x128xf32>
    %47 = tpu.concatenate %45, %44, %46 in 0 : vector<2x128xf32>, vector<16x128xf32>, vector<6x128xf32> -> vector<24x128xf32>
    %cst_25 = arith.constant 0.479438305 : f32
    %48 = vector.broadcast %cst_25 : f32 to vector<24x128xf32>
    %49 = arith.mulf %48, %47 : vector<24x128xf32>
    %c1_i32_26 = arith.constant 1 : i32
    %50 = tpu.dynamic_rotate %47 by %c1_i32_26 dim 0 : vector<24x128xf32>, i32 -> vector<24x128xf32>
    %c23_i32_27 = arith.constant 23 : i32
    %51 = tpu.dynamic_rotate %47 by %c23_i32_27 dim 0 : vector<24x128xf32>, i32 -> vector<24x128xf32>
    %52 = arith.addf %50, %51 : vector<24x128xf32>
    %cst_28 = arith.constant 0.233367682 : f32
    %53 = vector.broadcast %cst_28 : f32 to vector<24x128xf32>
    %54 = arith.mulf %53, %52 : vector<24x128xf32>
    %55 = arith.addf %49, %54 : vector<24x128xf32>
    %c2_i32_29 = arith.constant 2 : i32
    %56 = tpu.dynamic_rotate %47 by %c2_i32_29 dim 0 : vector<24x128xf32>, i32 -> vector<24x128xf32>
    %c22_i32_30 = arith.constant 22 : i32
    %57 = tpu.dynamic_rotate %47 by %c22_i32_30 dim 0 : vector<24x128xf32>, i32 -> vector<24x128xf32>
    %58 = arith.addf %56, %57 : vector<24x128xf32>
    %cst_31 = arith.constant 0.0269131567 : f32
    %59 = vector.broadcast %cst_31 : f32 to vector<24x128xf32>
    %60 = arith.mulf %59, %58 : vector<24x128xf32>
    %61 = arith.addf %55, %60 : vector<24x128xf32>
    %cst_32 = arith.constant 0.479438305 : f32
    %62 = vector.broadcast %cst_32 : f32 to vector<24x128xf32>
    %63 = arith.mulf %62, %61 : vector<24x128xf32>
    %c1_i32_33 = arith.constant 1 : i32
    %64 = tpu.dynamic_rotate %61 by %c1_i32_33 dim 1 : vector<24x128xf32>, i32 -> vector<24x128xf32>
    %c127_i32_34 = arith.constant 127 : i32
    %65 = tpu.dynamic_rotate %61 by %c127_i32_34 dim 1 : vector<24x128xf32>, i32 -> vector<24x128xf32>
    %66 = arith.addf %64, %65 : vector<24x128xf32>
    %cst_35 = arith.constant 0.233367682 : f32
    %67 = vector.broadcast %cst_35 : f32 to vector<24x128xf32>
    %68 = arith.mulf %67, %66 : vector<24x128xf32>
    %69 = arith.addf %63, %68 : vector<24x128xf32>
    %c2_i32_36 = arith.constant 2 : i32
    %70 = tpu.dynamic_rotate %61 by %c2_i32_36 dim 1 : vector<24x128xf32>, i32 -> vector<24x128xf32>
    %c126_i32_37 = arith.constant 126 : i32
    %71 = tpu.dynamic_rotate %61 by %c126_i32_37 dim 1 : vector<24x128xf32>, i32 -> vector<24x128xf32>
    %72 = arith.addf %70, %71 : vector<24x128xf32>
    %cst_38 = arith.constant 0.0269131567 : f32
    %73 = vector.broadcast %cst_38 : f32 to vector<24x128xf32>
    %74 = arith.mulf %73, %72 : vector<24x128xf32>
    %75 = arith.addf %69, %74 : vector<24x128xf32>
    %76 = vector.extract_strided_slice %75 {offsets = [0, 0], sizes = [20, 20], strides = [1, 1]} : vector<24x128xf32> to vector<20x20xf32>
    %c0_39 = arith.constant 0 : index
    %c1_40 = arith.constant 1 : index
    %c0_41 = arith.constant 0 : index
    %c0_42 = arith.constant 0 : index
    %77 = vector.load %arg2[%c0_39, %c1_40, %c0_41, %c0_42] : memref<1x6x20x20xf32, #tpu.memory_space<vmem>>, vector<1x1x20x20xf32>
    %78 = vector.shape_cast %77 : vector<1x1x20x20xf32> to vector<20x20xf32>
    %79 = vector.shape_cast %76 : vector<20x20xf32> to vector<1x1x20x20xf32>
    tpu.vector_store %arg2[%c0_39, %c1_40, %c0_41, %c0_42], %79 {strides = array<i32>} : memref<1x6x20x20xf32, #tpu.memory_space<vmem>>, vector<1x1x20x20xf32>,
    %c0_43 = arith.constant 0 : index
    %c2 = arith.constant 2 : index
    %c0_44 = arith.constant 0 : index
    %c0_45 = arith.constant 0 : index
    %80 = vector.load %arg1[%c0_43, %c2, %c0_44, %c0_45] : memref<1x6x16x16xf32, #tpu.memory_space<vmem>>, vector<1x1x16x16xf32>
    %81 = vector.shape_cast %80 : vector<1x1x16x16xf32> to vector<16x16xf32>
    %cst_46 = arith.constant 0.000000e+00 : f32
    %82 = vector.broadcast %cst_46 : f32 to vector<16x2xf32>
    %cst_47 = arith.constant 0.000000e+00 : f32
    %83 = vector.broadcast %cst_47 : f32 to vector<16x110xf32>
    %84 = tpu.concatenate %82, %81, %83 in 1 : vector<16x2xf32>, vector<16x16xf32>, vector<16x110xf32> -> vector<16x128xf32>
    %cst_48 = arith.constant 0.000000e+00 : f32
    %85 = vector.broadcast %cst_48 : f32 to vector<2x128xf32>
    %cst_49 = arith.constant 0.000000e+00 : f32
    %86 = vector.broadcast %cst_49 : f32 to vector<6x128xf32>
    %87 = tpu.concatenate %85, %84, %86 in 0 : vector<2x128xf32>, vector<16x128xf32>, vector<6x128xf32> -> vector<24x128xf32>
    %cst_50 = arith.constant 0.479438305 : f32
    %88 = vector.broadcast %cst_50 : f32 to vector<24x128xf32>
    %89 = arith.mulf %88, %87 : vector<24x128xf32>
    %c1_i32_51 = arith.constant 1 : i32
    %90 = tpu.dynamic_rotate %87 by %c1_i32_51 dim 0 : vector<24x128xf32>, i32 -> vector<24x128xf32>
    %c23_i32_52 = arith.constant 23 : i32
    %91 = tpu.dynamic_rotate %87 by %c23_i32_52 dim 0 : vector<24x128xf32>, i32 -> vector<24x128xf32>
    %92 = arith.addf %90, %91 : vector<24x128xf32>
    %cst_53 = arith.constant 0.233367682 : f32
    %93 = vector.broadcast %cst_53 : f32 to vector<24x128xf32>
    %94 = arith.mulf %93, %92 : vector<24x128xf32>
    %95 = arith.addf %89, %94 : vector<24x128xf32>
    %c2_i32_54 = arith.constant 2 : i32
    %96 = tpu.dynamic_rotate %87 by %c2_i32_54 dim 0 : vector<24x128xf32>, i32 -> vector<24x128xf32>
    %c22_i32_55 = arith.constant 22 : i32
    %97 = tpu.dynamic_rotate %87 by %c22_i32_55 dim 0 : vector<24x128xf32>, i32 -> vector<24x128xf32>
    %98 = arith.addf %96, %97 : vector<24x128xf32>
    %cst_56 = arith.constant 0.0269131567 : f32
    %99 = vector.broadcast %cst_56 : f32 to vector<24x128xf32>
    %100 = arith.mulf %99, %98 : vector<24x128xf32>
    %101 = arith.addf %95, %100 : vector<24x128xf32>
    %cst_57 = arith.constant 0.479438305 : f32
    %102 = vector.broadcast %cst_57 : f32 to vector<24x128xf32>
    %103 = arith.mulf %102, %101 : vector<24x128xf32>
    %c1_i32_58 = arith.constant 1 : i32
    %104 = tpu.dynamic_rotate %101 by %c1_i32_58 dim 1 : vector<24x128xf32>, i32 -> vector<24x128xf32>
    %c127_i32_59 = arith.constant 127 : i32
    %105 = tpu.dynamic_rotate %101 by %c127_i32_59 dim 1 : vector<24x128xf32>, i32 -> vector<24x128xf32>
    %106 = arith.addf %104, %105 : vector<24x128xf32>
    %cst_60 = arith.constant 0.233367682 : f32
    %107 = vector.broadcast %cst_60 : f32 to vector<24x128xf32>
    %108 = arith.mulf %107, %106 : vector<24x128xf32>
    %109 = arith.addf %103, %108 : vector<24x128xf32>
    %c2_i32_61 = arith.constant 2 : i32
    %110 = tpu.dynamic_rotate %101 by %c2_i32_61 dim 1 : vector<24x128xf32>, i32 -> vector<24x128xf32>
    %c126_i32_62 = arith.constant 126 : i32
    %111 = tpu.dynamic_rotate %101 by %c126_i32_62 dim 1 : vector<24x128xf32>, i32 -> vector<24x128xf32>
    %112 = arith.addf %110, %111 : vector<24x128xf32>
    %cst_63 = arith.constant 0.0269131567 : f32
    %113 = vector.broadcast %cst_63 : f32 to vector<24x128xf32>
    %114 = arith.mulf %113, %112 : vector<24x128xf32>
    %115 = arith.addf %109, %114 : vector<24x128xf32>
    %116 = vector.extract_strided_slice %115 {offsets = [0, 0], sizes = [20, 20], strides = [1, 1]} : vector<24x128xf32> to vector<20x20xf32>
    %c0_64 = arith.constant 0 : index
    %c2_65 = arith.constant 2 : index
    %c0_66 = arith.constant 0 : index
    %c0_67 = arith.constant 0 : index
    %117 = vector.load %arg2[%c0_64, %c2_65, %c0_66, %c0_67] : memref<1x6x20x20xf32, #tpu.memory_space<vmem>>, vector<1x1x20x20xf32>
    %118 = vector.shape_cast %117 : vector<1x1x20x20xf32> to vector<20x20xf32>
    %119 = vector.shape_cast %116 : vector<20x20xf32> to vector<1x1x20x20xf32>
    tpu.vector_store %arg2[%c0_64, %c2_65, %c0_66, %c0_67], %119 {strides = array<i32>} : memref<1x6x20x20xf32, #tpu.memory_space<vmem>>, vector<1x1x20x20xf32>,
    %c0_68 = arith.constant 0 : index
    %c3 = arith.constant 3 : index
    %c0_69 = arith.constant 0 : index
    %c0_70 = arith.constant 0 : index
    %120 = vector.load %arg1[%c0_68, %c3, %c0_69, %c0_70] : memref<1x6x16x16xf32, #tpu.memory_space<vmem>>, vector<1x1x16x16xf32>
    %121 = vector.shape_cast %120 : vector<1x1x16x16xf32> to vector<16x16xf32>
    %cst_71 = arith.constant 0.000000e+00 : f32
    %122 = vector.broadcast %cst_71 : f32 to vector<16x2xf32>
    %cst_72 = arith.constant 0.000000e+00 : f32
    %123 = vector.broadcast %cst_72 : f32 to vector<16x110xf32>
    %124 = tpu.concatenate %122, %121, %123 in 1 : vector<16x2xf32>, vector<16x16xf32>, vector<16x110xf32> -> vector<16x128xf32>
    %cst_73 = arith.constant 0.000000e+00 : f32
    %125 = vector.broadcast %cst_73 : f32 to vector<2x128xf32>
    %cst_74 = arith.constant 0.000000e+00 : f32
    %126 = vector.broadcast %cst_74 : f32 to vector<6x128xf32>
    %127 = tpu.concatenate %125, %124, %126 in 0 : vector<2x128xf32>, vector<16x128xf32>, vector<6x128xf32> -> vector<24x128xf32>
    %cst_75 = arith.constant 0.479438305 : f32
    %128 = vector.broadcast %cst_75 : f32 to vector<24x128xf32>
    %129 = arith.mulf %128, %127 : vector<24x128xf32>
    %c1_i32_76 = arith.constant 1 : i32
    %130 = tpu.dynamic_rotate %127 by %c1_i32_76 dim 0 : vector<24x128xf32>, i32 -> vector<24x128xf32>
    %c23_i32_77 = arith.constant 23 : i32
    %131 = tpu.dynamic_rotate %127 by %c23_i32_77 dim 0 : vector<24x128xf32>, i32 -> vector<24x128xf32>
    %132 = arith.addf %130, %131 : vector<24x128xf32>
    %cst_78 = arith.constant 0.233367682 : f32
    %133 = vector.broadcast %cst_78 : f32 to vector<24x128xf32>
    %134 = arith.mulf %133, %132 : vector<24x128xf32>
    %135 = arith.addf %129, %134 : vector<24x128xf32>
    %c2_i32_79 = arith.constant 2 : i32
    %136 = tpu.dynamic_rotate %127 by %c2_i32_79 dim 0 : vector<24x128xf32>, i32 -> vector<24x128xf32>
    %c22_i32_80 = arith.constant 22 : i32
    %137 = tpu.dynamic_rotate %127 by %c22_i32_80 dim 0 : vector<24x128xf32>, i32 -> vector<24x128xf32>
    %138 = arith.addf %136, %137 : vector<24x128xf32>
    %cst_81 = arith.constant 0.0269131567 : f32
    %139 = vector.broadcast %cst_81 : f32 to vector<24x128xf32>
    %140 = arith.mulf %139, %138 : vector<24x128xf32>
    %141 = arith.addf %135, %140 : vector<24x128xf32>
    %cst_82 = arith.constant 0.479438305 : f32
    %142 = vector.broadcast %cst_82 : f32 to vector<24x128xf32>
    %143 = arith.mulf %142, %141 : vector<24x128xf32>
    %c1_i32_83 = arith.constant 1 : i32
    %144 = tpu.dynamic_rotate %141 by %c1_i32_83 dim 1 : vector<24x128xf32>, i32 -> vector<24x128xf32>
    %c127_i32_84 = arith.constant 127 : i32
    %145 = tpu.dynamic_rotate %141 by %c127_i32_84 dim 1 : vector<24x128xf32>, i32 -> vector<24x128xf32>
    %146 = arith.addf %144, %145 : vector<24x128xf32>
    %cst_85 = arith.constant 0.233367682 : f32
    %147 = vector.broadcast %cst_85 : f32 to vector<24x128xf32>
    %148 = arith.mulf %147, %146 : vector<24x128xf32>
    %149 = arith.addf %143, %148 : vector<24x128xf32>
    %c2_i32_86 = arith.constant 2 : i32
    %150 = tpu.dynamic_rotate %141 by %c2_i32_86 dim 1 : vector<24x128xf32>, i32 -> vector<24x128xf32>
    %c126_i32_87 = arith.constant 126 : i32
    %151 = tpu.dynamic_rotate %141 by %c126_i32_87 dim 1 : vector<24x128xf32>, i32 -> vector<24x128xf32>
    %152 = arith.addf %150, %151 : vector<24x128xf32>
    %cst_88 = arith.constant 0.0269131567 : f32
    %153 = vector.broadcast %cst_88 : f32 to vector<24x128xf32>
    %154 = arith.mulf %153, %152 : vector<24x128xf32>
    %155 = arith.addf %149, %154 : vector<24x128xf32>
    %156 = vector.extract_strided_slice %155 {offsets = [0, 0], sizes = [20, 20], strides = [1, 1]} : vector<24x128xf32> to vector<20x20xf32>
    %c0_89 = arith.constant 0 : index
    %c3_90 = arith.constant 3 : index
    %c0_91 = arith.constant 0 : index
    %c0_92 = arith.constant 0 : index
    %157 = vector.load %arg2[%c0_89, %c3_90, %c0_91, %c0_92] : memref<1x6x20x20xf32, #tpu.memory_space<vmem>>, vector<1x1x20x20xf32>
    %158 = vector.shape_cast %157 : vector<1x1x20x20xf32> to vector<20x20xf32>
    %159 = vector.shape_cast %156 : vector<20x20xf32> to vector<1x1x20x20xf32>
    tpu.vector_store %arg2[%c0_89, %c3_90, %c0_91, %c0_92], %159 {strides = array<i32>} : memref<1x6x20x20xf32, #tpu.memory_space<vmem>>, vector<1x1x20x20xf32>,
    %c0_93 = arith.constant 0 : index
    %c4 = arith.constant 4 : index
    %c0_94 = arith.constant 0 : index
    %c0_95 = arith.constant 0 : index
    %160 = vector.load %arg1[%c0_93, %c4, %c0_94, %c0_95] : memref<1x6x16x16xf32, #tpu.memory_space<vmem>>, vector<1x1x16x16xf32>
    %161 = vector.shape_cast %160 : vector<1x1x16x16xf32> to vector<16x16xf32>
    %cst_96 = arith.constant 0.000000e+00 : f32
    %162 = vector.broadcast %cst_96 : f32 to vector<16x2xf32>
    %cst_97 = arith.constant 0.000000e+00 : f32
    %163 = vector.broadcast %cst_97 : f32 to vector<16x110xf32>
    %164 = tpu.concatenate %162, %161, %163 in 1 : vector<16x2xf32>, vector<16x16xf32>, vector<16x110xf32> -> vector<16x128xf32>
    %cst_98 = arith.constant 0.000000e+00 : f32
    %165 = vector.broadcast %cst_98 : f32 to vector<2x128xf32>
    %cst_99 = arith.constant 0.000000e+00 : f32
    %166 = vector.broadcast %cst_99 : f32 to vector<6x128xf32>
    %167 = tpu.concatenate %165, %164, %166 in 0 : vector<2x128xf32>, vector<16x128xf32>, vector<6x128xf32> -> vector<24x128xf32>
    %cst_100 = arith.constant 0.479438305 : f32
    %168 = vector.broadcast %cst_100 : f32 to vector<24x128xf32>
    %169 = arith.mulf %168, %167 : vector<24x128xf32>
    %c1_i32_101 = arith.constant 1 : i32
    %170 = tpu.dynamic_rotate %167 by %c1_i32_101 dim 0 : vector<24x128xf32>, i32 -> vector<24x128xf32>
    %c23_i32_102 = arith.constant 23 : i32
    %171 = tpu.dynamic_rotate %167 by %c23_i32_102 dim 0 : vector<24x128xf32>, i32 -> vector<24x128xf32>
    %172 = arith.addf %170, %171 : vector<24x128xf32>
    %cst_103 = arith.constant 0.233367682 : f32
    %173 = vector.broadcast %cst_103 : f32 to vector<24x128xf32>
    %174 = arith.mulf %173, %172 : vector<24x128xf32>
    %175 = arith.addf %169, %174 : vector<24x128xf32>
    %c2_i32_104 = arith.constant 2 : i32
    %176 = tpu.dynamic_rotate %167 by %c2_i32_104 dim 0 : vector<24x128xf32>, i32 -> vector<24x128xf32>
    %c22_i32_105 = arith.constant 22 : i32
    %177 = tpu.dynamic_rotate %167 by %c22_i32_105 dim 0 : vector<24x128xf32>, i32 -> vector<24x128xf32>
    %178 = arith.addf %176, %177 : vector<24x128xf32>
    %cst_106 = arith.constant 0.0269131567 : f32
    %179 = vector.broadcast %cst_106 : f32 to vector<24x128xf32>
    %180 = arith.mulf %179, %178 : vector<24x128xf32>
    %181 = arith.addf %175, %180 : vector<24x128xf32>
    %cst_107 = arith.constant 0.479438305 : f32
    %182 = vector.broadcast %cst_107 : f32 to vector<24x128xf32>
    %183 = arith.mulf %182, %181 : vector<24x128xf32>
    %c1_i32_108 = arith.constant 1 : i32
    %184 = tpu.dynamic_rotate %181 by %c1_i32_108 dim 1 : vector<24x128xf32>, i32 -> vector<24x128xf32>
    %c127_i32_109 = arith.constant 127 : i32
    %185 = tpu.dynamic_rotate %181 by %c127_i32_109 dim 1 : vector<24x128xf32>, i32 -> vector<24x128xf32>
    %186 = arith.addf %184, %185 : vector<24x128xf32>
    %cst_110 = arith.constant 0.233367682 : f32
    %187 = vector.broadcast %cst_110 : f32 to vector<24x128xf32>
    %188 = arith.mulf %187, %186 : vector<24x128xf32>
    %189 = arith.addf %183, %188 : vector<24x128xf32>
    %c2_i32_111 = arith.constant 2 : i32
    %190 = tpu.dynamic_rotate %181 by %c2_i32_111 dim 1 : vector<24x128xf32>, i32 -> vector<24x128xf32>
    %c126_i32_112 = arith.constant 126 : i32
    %191 = tpu.dynamic_rotate %181 by %c126_i32_112 dim 1 : vector<24x128xf32>, i32 -> vector<24x128xf32>
    %192 = arith.addf %190, %191 : vector<24x128xf32>
    %cst_113 = arith.constant 0.0269131567 : f32
    %193 = vector.broadcast %cst_113 : f32 to vector<24x128xf32>
    %194 = arith.mulf %193, %192 : vector<24x128xf32>
    %195 = arith.addf %189, %194 : vector<24x128xf32>
    %196 = vector.extract_strided_slice %195 {offsets = [0, 0], sizes = [20, 20], strides = [1, 1]} : vector<24x128xf32> to vector<20x20xf32>
    %c0_114 = arith.constant 0 : index
    %c4_115 = arith.constant 4 : index
    %c0_116 = arith.constant 0 : index
    %c0_117 = arith.constant 0 : index
    %197 = vector.load %arg2[%c0_114, %c4_115, %c0_116, %c0_117] : memref<1x6x20x20xf32, #tpu.memory_space<vmem>>, vector<1x1x20x20xf32>
    %198 = vector.shape_cast %197 : vector<1x1x20x20xf32> to vector<20x20xf32>
    %199 = vector.shape_cast %196 : vector<20x20xf32> to vector<1x1x20x20xf32>
    tpu.vector_store %arg2[%c0_114, %c4_115, %c0_116, %c0_117], %199 {strides = array<i32>} : memref<1x6x20x20xf32, #tpu.memory_space<vmem>>, vector<1x1x20x20xf32>,
    %c0_118 = arith.constant 0 : index
    %c5 = arith.constant 5 : index
    %c0_119 = arith.constant 0 : index
    %c0_120 = arith.constant 0 : index
    %200 = vector.load %arg1[%c0_118, %c5, %c0_119, %c0_120] : memref<1x6x16x16xf32, #tpu.memory_space<vmem>>, vector<1x1x16x16xf32>
    %201 = vector.shape_cast %200 : vector<1x1x16x16xf32> to vector<16x16xf32>
    %cst_121 = arith.constant 0.000000e+00 : f32
    %202 = vector.broadcast %cst_121 : f32 to vector<16x2xf32>
    %cst_122 = arith.constant 0.000000e+00 : f32
    %203 = vector.broadcast %cst_122 : f32 to vector<16x110xf32>
    %204 = tpu.concatenate %202, %201, %203 in 1 : vector<16x2xf32>, vector<16x16xf32>, vector<16x110xf32> -> vector<16x128xf32>
    %cst_123 = arith.constant 0.000000e+00 : f32
    %205 = vector.broadcast %cst_123 : f32 to vector<2x128xf32>
    %cst_124 = arith.constant 0.000000e+00 : f32
    %206 = vector.broadcast %cst_124 : f32 to vector<6x128xf32>
    %207 = tpu.concatenate %205, %204, %206 in 0 : vector<2x128xf32>, vector<16x128xf32>, vector<6x128xf32> -> vector<24x128xf32>
    %cst_125 = arith.constant 0.479438305 : f32
    %208 = vector.broadcast %cst_125 : f32 to vector<24x128xf32>
    %209 = arith.mulf %208, %207 : vector<24x128xf32>
    %c1_i32_126 = arith.constant 1 : i32
    %210 = tpu.dynamic_rotate %207 by %c1_i32_126 dim 0 : vector<24x128xf32>, i32 -> vector<24x128xf32>
    %c23_i32_127 = arith.constant 23 : i32
    %211 = tpu.dynamic_rotate %207 by %c23_i32_127 dim 0 : vector<24x128xf32>, i32 -> vector<24x128xf32>
    %212 = arith.addf %210, %211 : vector<24x128xf32>
    %cst_128 = arith.constant 0.233367682 : f32
    %213 = vector.broadcast %cst_128 : f32 to vector<24x128xf32>
    %214 = arith.mulf %213, %212 : vector<24x128xf32>
    %215 = arith.addf %209, %214 : vector<24x128xf32>
    %c2_i32_129 = arith.constant 2 : i32
    %216 = tpu.dynamic_rotate %207 by %c2_i32_129 dim 0 : vector<24x128xf32>, i32 -> vector<24x128xf32>
    %c22_i32_130 = arith.constant 22 : i32
    %217 = tpu.dynamic_rotate %207 by %c22_i32_130 dim 0 : vector<24x128xf32>, i32 -> vector<24x128xf32>
    %218 = arith.addf %216, %217 : vector<24x128xf32>
    %cst_131 = arith.constant 0.0269131567 : f32
    %219 = vector.broadcast %cst_131 : f32 to vector<24x128xf32>
    %220 = arith.mulf %219, %218 : vector<24x128xf32>
    %221 = arith.addf %215, %220 : vector<24x128xf32>
    %cst_132 = arith.constant 0.479438305 : f32
    %222 = vector.broadcast %cst_132 : f32 to vector<24x128xf32>
    %223 = arith.mulf %222, %221 : vector<24x128xf32>
    %c1_i32_133 = arith.constant 1 : i32
    %224 = tpu.dynamic_rotate %221 by %c1_i32_133 dim 1 : vector<24x128xf32>, i32 -> vector<24x128xf32>
    %c127_i32_134 = arith.constant 127 : i32
    %225 = tpu.dynamic_rotate %221 by %c127_i32_134 dim 1 : vector<24x128xf32>, i32 -> vector<24x128xf32>
    %226 = arith.addf %224, %225 : vector<24x128xf32>
    %cst_135 = arith.constant 0.233367682 : f32
    %227 = vector.broadcast %cst_135 : f32 to vector<24x128xf32>
    %228 = arith.mulf %227, %226 : vector<24x128xf32>
    %229 = arith.addf %223, %228 : vector<24x128xf32>
    %c2_i32_136 = arith.constant 2 : i32
    %230 = tpu.dynamic_rotate %221 by %c2_i32_136 dim 1 : vector<24x128xf32>, i32 -> vector<24x128xf32>
    %c126_i32_137 = arith.constant 126 : i32
    %231 = tpu.dynamic_rotate %221 by %c126_i32_137 dim 1 : vector<24x128xf32>, i32 -> vector<24x128xf32>
    %232 = arith.addf %230, %231 : vector<24x128xf32>
    %cst_138 = arith.constant 0.0269131567 : f32
    %233 = vector.broadcast %cst_138 : f32 to vector<24x128xf32>
    %234 = arith.mulf %233, %232 : vector<24x128xf32>
    %235 = arith.addf %229, %234 : vector<24x128xf32>
    %236 = vector.extract_strided_slice %235 {offsets = [0, 0], sizes = [20, 20], strides = [1, 1]} : vector<24x128xf32> to vector<20x20xf32>
    %c0_139 = arith.constant 0 : index
    %c5_140 = arith.constant 5 : index
    %c0_141 = arith.constant 0 : index
    %c0_142 = arith.constant 0 : index
    %237 = vector.load %arg2[%c0_139, %c5_140, %c0_141, %c0_142] : memref<1x6x20x20xf32, #tpu.memory_space<vmem>>, vector<1x1x20x20xf32>
    %238 = vector.shape_cast %237 : vector<1x1x20x20xf32> to vector<20x20xf32>
    %239 = vector.shape_cast %236 : vector<20x20xf32> to vector<1x1x20x20xf32>
    tpu.vector_store %arg2[%c0_139, %c5_140, %c0_141, %c0_142], %239 {strides = array<i32>} : memref<1x6x20x20xf32, #tpu.memory_space<vmem>>, vector<1x1x20x20xf32>,
    return
  }
  func.func @transform_0(%arg0: i32) -> (i32, i32, i32, i32) {
    %c0_i32 = arith.constant 0 : i32
    %c0_i32_0 = arith.constant 0 : i32
    %c0_i32_1 = arith.constant 0 : i32
    %c0_i32_2 = arith.constant 0 : i32
    return %arg0, %c0_i32, %c0_i32_0, %c0_i32_1 : i32, i32, i32, i32
  }
  func.func @transform_1(%arg0: i32) -> (i32, i32, i32, i32) {
    %c0_i32 = arith.constant 0 : i32
    %c0_i32_0 = arith.constant 0 : i32
    %c0_i32_1 = arith.constant 0 : i32
    %c0_i32_2 = arith.constant 0 : i32
    return %arg0, %c0_i32, %c0_i32_0, %c0_i32_1 : i32, i32, i32, i32
  }
}

</mosaic_0001>

<bundles_post_ra>
// kernel: tpu_custom_call.1
= control target key start
LH: loop header
LB: loop body
LE: loop exit
PB: predicated region body
PF: predicated region fallthrough
CT: control target
= control target key end

     0   :  { %6 = vsyncpa [#allocation3], 0  ;;  %s796_s6 = smov [#allocation2]   ;;  %s1452_s0 = inlined_call_operand.hbm [shape: f32[1,6,16,16], index: 0, kind: input, shape index: {}]   ;;  %s1453_s1 = inlined_call_operand.vmem [shape: f32[1,6,20,20], index: 1, kind: output, shape index: {}]  }
   0x1   :  { %s12_s7 = sshll.u32 %s796_s6, 4  ;;  %s772_s10 = scalar_lea.hbm %s1452_s0, 1536  ;;  %s13_s7 = int_to_ptr.vmem [resolvable:$true] %s12_s7 }
   0x2   :  { %p773_p0 = scmp.ne.s32.totalorder %s1452_s0, %s772_s10  ;;  %p776_p1 = scmp.lt.u32.totalorder %s772_s10, %s1452_s0 }
   0x4   :  { %p778_p2 = pnand %p776_p1, %p773_p0 }
   0x6   :  { %781 = shalt.err (!%p778_p2)
}
   0x7   :  { %s782_s15 = scalar_lea.vmem %s13_s7, 1536  ;;  %p787_p4 = scmp.lt.s32.totalorder %s13_s7, %s13_s7 }
   0x8   :  { %p783_p3 = scmp.ne.s32.totalorder %s13_s7, %s782_s15  ;;  %p788_p5 = scmp.lt.s32.totalorder %s782_s15, %s782_s15 }
   0xa   :  { %p789_p6 = por %p788_p5, %p787_p4 }
   0xc   :  { %p790_p7 = pnand %p789_p6, %p783_p3 }
   0xe   :  { %793 = shalt.err (!%p790_p7)
}
   0xf   :  { %s797_s16 = smov 128   ;;  %s798_s17 = smov 8  }
  0x10   :  { %18 = dma.hbm_to_vmem [thread:$0]  %s1452_s0, 1536, %s13_s7, [#allocation3], %s797_s16, %s797_s16, %s798_s17  }
  0x11   :  { %794 = dma.done.wait [#allocation3], 1536  }
  0x12   :  { %795 = vsyncadd [#allocation3], 4294965760  ;;  %v22_v0 = vld [vmem:[#allocation2] sm:$0xff]  ;;  %v152_v1 = vld [vmem:[#allocation2 + $0x18] sm:$0xff]  ;;  %s799_s20 = smov 2   ;;  %v55_v12 = vlaneseq  ;;  %vm32_vm0 = vcmask 15360  }
  0x13   :  { %26 = vrot.lane.b32.xlu0 %v22_v0, %s799_s20  ;;  %157 = vrot.lane.b32.xlu1 %v152_v1, %s799_s20  ;;  %v23_v2 = vld [vmem:[#allocation2 + $0x8] sm:$0xff]  ;;  %v151_v4 = vld [vmem:[#allocation2 + $0x10] sm:$0xff]  ;;  %v390_v5 = vld [vmem:[#allocation2 + $0x38] sm:$0xff]  ;;  %vm35_vm1 = vcmask 146432   ;;  %vm40_vm2 = vcmask 1041408   ;;  %s800_s0 = smov 1  }
  0x14   :  { %v271_v3 = vld [vmem:[#allocation2 + $0x28] sm:$0xff]  ;;  %v270_v6 = vld [vmem:[#allocation2 + $0x20] sm:$0xff]  ;;  %v389_v8 = vld [vmem:[#allocation2 + $0x30] sm:$0xff]  ;;  %v837_v14 = vshrl.u32 %v55_v12, 7  ;;  %s801_s21 = smov 127   ;;  %s802_s22 = smov 126  }
  0x15   :  { %v509_v7 = vld [vmem:[#allocation2 + $0x48] sm:$0xff]  ;;  %v628_v9 = vld [vmem:[#allocation2 + $0x58] sm:$0xff]  ;;  %v508_v10 = vld [vmem:[#allocation2 + $0x40] sm:$0xff]  ;;  %vm145_vm7 = vcmask 162816   ;;  %vm148_vm8 = vcmask 158720  }
  0x16   :  { %v627_v11 = vld [vmem:[#allocation2 + $0x50] sm:$0xff]  ;;  %vm57_vm3 = vcmp.lt.s32.totalorder %v837_v14, 1  ;;  %vm64_vm4 = vcmp.lt.s32.totalorder %v837_v14, 7  ;;  %vm80_vm5 = vcmp.lt.s32.totalorder %v837_v14, 2  ;;  %vm87_vm6 = vcmp.lt.s32.totalorder %v837_v14, 6 }
  0x17   :  { %28 = vrot.lane.b32.xlu0 %v23_v2, %s799_s20  ;;  %276 = vrot.lane.b32.xlu1 %v271_v3, %s799_s20 }
  0x1b   :  { %155 = vrot.lane.b32.xlu0 %v151_v4, %s799_s20  ;;  %395 = vrot.lane.b32.xlu1 %v390_v5, %s799_s20 }
  0x1f   :  { %274 = vrot.lane.b32.xlu0 %v270_v6, %s799_s20  ;;  %514 = vrot.lane.b32.xlu1 %v509_v7, %s799_s20 }
  0x23   :  { %393 = vrot.lane.b32.xlu0 %v389_v8, %s799_s20  ;;  %633 = vrot.lane.b32.xlu1 %v628_v9, %s799_s20 }
  0x27   :  { %512 = vrot.lane.b32.xlu0 %v508_v10, %s799_s20 }
  0x2b   :  { %631 = vrot.lane.b32.xlu0 %v627_v11, %s799_s20 }
  0x85   :  { %v27_v13 = vpop.permute.xlu0 %26  ;;  %v158_v15 = vpop.permute.xlu1 %157 }
  0x86   :  { %v33_v16 = vsel %vm32_vm0, 0.0, %v27_v13  ;;  %v162_v17 = vsel %vm32_vm0, 0.0, %v158_v15 }
  0x87   :  { %v36_v18 = vsel %vm35_vm1, %v33_v16, 0.0  ;;  %v843_v19 = vsel %vm35_vm1, %v162_v17, 0.0 }
  0x88   :  { %v41_v20 = vrot.slane %v36_v18, 6  ;;  %v168_v21 = vrot.slane %v843_v19, 6 }
  0x89   :  { %v29_v22 = vpop.permute.xlu0 %28  ;;  %v277_v23 = vpop.permute.xlu1 %276 }
  0x8a   :  { %v47_v24 = vsel %vm40_vm2, 0.0, %v41_v20  ;;  %v34_v25 = vsel %vm32_vm0, 0.0, %v29_v22  ;;  %v855_v26 = vsel %vm40_vm2, %v168_v21, 0.0  ;;  %v281_v30 = vsel %vm32_vm0, 0.0, %v277_v23 }
  0x8b   :  { %v49_v27 = vmul.f32 0.4794383, %v47_v24  ;;  %v52_v28 = vrot.slane %v47_v24, 7  ;;  %v61_v29 = vrot.slane %v47_v24, 1  ;;  %v77_v31 = vrot.slane %v47_v24, 6 }
  0x8c   :  { %v84_v32 = vrot.slane %v47_v24, 2  ;;  %v37_v33 = vsel %vm35_vm1, %v34_v25, 0.0  ;;  %v860_v34 = vmul.f32 0.4794383, %v855_v26  ;;  %v180_v36 = vrot.slane %v855_v26, 7 }
  0x8d   :  { %v42_v35 = vrot.slane %v37_v33, 6  ;;  %v186_v37 = vrot.slane %v855_v26, 1  ;;  %v201_v38 = vrot.slane %v855_v26, 6  ;;  %v156_v39 = vpop.permute.xlu0 %155  ;;  %v396_v40 = vpop.permute.xlu1 %395  ;;  %v207_v41 = vrot.slane %v855_v26, 2 }
  0x8e   :  { %v161_v42 = vsel %vm32_vm0, 0.0, %v156_v39  ;;  %v868_v43 = vsel %vm35_vm1, %v281_v30, 0.0  ;;  %v871_v44 = vsel %vm32_vm0, 0.0, %v396_v40 }
  0x8f   :  { %v43_v45 = vsel %vm40_vm2, %v41_v20, %v42_v35  ;;  %v48_v46 = vsel %vm40_vm2, %v42_v35, 0.0  ;;  %v163_v47 = vsel %vm35_vm1, %v161_v42, 0.0  ;;  %v287_v48 = vrot.slane %v868_v43, 6 }
  0x90   :  { %v877_v49 = vmul.f32 0.4794383, %v43_v45  ;;  %v51_v50 = vmul.f32 0.4794383, %v48_v46  ;;  %v53_v51 = vrot.slane %v43_v45, 7  ;;  %v54_v52 = vrot.slane %v48_v46, 7 }
  0x91   :  { %v62_v53 = vrot.slane %v43_v45, 1  ;;  %v63_v54 = vrot.slane %v48_v46, 1  ;;  %v78_v55 = vrot.slane %v43_v45, 6  ;;  %v79_v56 = vrot.slane %v48_v46, 6 }
  0x92   :  { %v58_v57 = vsel %vm57_vm3, %v53_v51, %v54_v52  ;;  %v59_v58 = vsel %vm57_vm3, %v52_v28, %v53_v51  ;;  %v60_v59 = vsel %vm57_vm3, %v54_v52, %v52_v28  ;;  %v85_v60 = vrot.slane %v43_v45, 2  ;;  %v275_v45 = vpop.permute.xlu0 %274 }
  0x93   :  { %v65_v61 = vsel %vm64_vm4, %v62_v53, %v63_v54  ;;  %v66_v62 = vsel %vm64_vm4, %v61_v29, %v62_v53  ;;  %v67_v63 = vsel %vm64_vm4, %v63_v54, %v61_v29  ;;  %v81_v0 = vsel %vm80_vm5, %v78_v55, %v79_v56 }
  0x94   :  { %v68_v1 = vadd.f32 %v66_v62, %v60_v59  ;;  %v69_v2 = vadd.f32 %v65_v61, %v59_v58  ;;  %v70_v3 = vadd.f32 %v67_v63, %v58_v57  ;;  %v83_v4 = vsel %vm80_vm5, %v79_v56, %v77_v31 }
  0x95   :  { %v86_v5 = vrot.slane %v48_v46, 2  ;;  %v89_v6 = vsel %vm87_vm6, %v84_v32, %v85_v60  ;;  %v167_v7 = vrot.slane %v163_v47, 6  ;;  %v82_v8 = vsel %vm80_vm5, %v77_v31, %v78_v55 }
  0x96   :  { %v73_v9 = vmul.f32 0.23336768, %v70_v3  ;;  %v71_v10 = vmul.f32 0.23336768, %v68_v1  ;;  %v91_v11 = vadd.f32 %v89_v6, %v83_v4  ;;  %v72_v12 = vmul.f32 0.23336768, %v69_v2  ;;  %v394_v62 = vpop.permute.xlu0 %393 }
  0x97   :  { %v88_v13 = vsel %vm87_vm6, %v85_v60, %v86_v5  ;;  %v90_v15 = vsel %vm87_vm6, %v86_v5, %v84_v32  ;;  %v169_v16 = vsel %vm40_vm2, %v167_v7, %v168_v21  ;;  %v173_v17 = vsel %vm40_vm2, 0.0, %v167_v7 }
  0x98   :  { %v76_v18 = vadd.f32 %v73_v9, %v51_v50  ;;  %v74_v20 = vadd.f32 %v71_v10, %v49_v27  ;;  %v94_v22 = vmul.f32 0.026913157, %v91_v11  ;;  %v93_v23 = vadd.f32 %v90_v15, %v81_v0 }
  0x99   :  { %v175_v24 = vmul.f32 0.4794383, %v173_v17  ;;  %v907_v25 = vmul.f32 0.4794383, %v169_v16  ;;  %v178_v28 = vrot.slane %v173_v17, 7  ;;  %v179_v29 = vrot.slane %v169_v16, 7 }
  0x9a   :  { %v909_v30 = vadd.f32 %v94_v22, %v74_v20  ;;  %v96_v31 = vmul.f32 0.026913157, %v93_v23  ;;  %v184_v33 = vrot.slane %v173_v17, 1  ;;  %v185_v32 = vrot.slane %v169_v16, 1  ;;  %v513_v15 = vpop.permute.xlu0 %512 }
  0x9b   :  { %v181_v19 = vsel %vm57_vm3, %v179_v29, %v180_v36  ;;  %v182_v21 = vsel %vm57_vm3, %v178_v28, %v179_v29  ;;  %v183_v27 = vsel %vm57_vm3, %v180_v36, %v178_v28  ;;  %v199_v35 = vrot.slane %v173_v17, 6 }
  0x9c   :  { %103 = vrot.lane.b32.xlu1 %v909_v30, %s800_s0  ;;  %v919_v39 = vadd.f32 %v96_v31, %v76_v18  ;;  %v187_v40 = vsel %vm64_vm4, %v185_v32, %v186_v37  ;;  %v188_v42 = vsel %vm64_vm4, %v184_v33, %v185_v32  ;;  %v189_v36 = vsel %vm64_vm4, %v186_v37, %v184_v33 }
  0x9d   :  { %v190_v46 = vadd.f32 %v188_v42, %v183_v27  ;;  %v191_v47 = vadd.f32 %v187_v40, %v182_v21  ;;  %v192_v50 = vadd.f32 %v189_v36, %v181_v19  ;;  %v200_v51 = vrot.slane %v169_v16, 6 }
  0x9e   :  { %107 = vrot.lane.b32.xlu0 %v919_v39, %s800_s0  ;;  %v204_v52 = vsel %vm80_vm5, %v201_v38, %v199_v35  ;;  %v205_v53 = vrot.slane %v173_v17, 2  ;;  %v206_v54 = vrot.slane %v169_v16, 2  ;;  %v75_v55 = vadd.f32 %v72_v12, %v877_v49 }
  0x9f   :  { %v193_v56 = vmul.f32 0.23336768, %v190_v46  ;;  %v203_v37 = vsel %vm80_vm5, %v199_v35, %v200_v51  ;;  %v92_v57 = vadd.f32 %v88_v13, %v82_v8  ;;  %v195_v58 = vmul.f32 0.23336768, %v192_v50  ;;  %v515_v13 = vpop.permute.xlu1 %514 }
  0xa0   :  { %v209_v59 = vsel %vm87_vm6, %v205_v53, %v206_v54  ;;  %v210_v60 = vsel %vm87_vm6, %v207_v41, %v205_v53  ;;  %v202_v61 = vsel %vm80_vm5, %v200_v51, %v201_v38  ;;  %v953_v49 = vsel %vm40_vm2, %v287_v48, 0.0 }
  0xa1   :  { %v196_v63 = vadd.f32 %v193_v56, %v175_v24  ;;  %v95_v0 = vmul.f32 0.026913157, %v92_v57  ;;  %v211_v1 = vadd.f32 %v209_v59, %v204_v52  ;;  %v198_v2 = vadd.f32 %v195_v58, %v860_v34 }
  0xa2   :  { %v213_v3 = vadd.f32 %v210_v60, %v202_v61  ;;  %v957_v4 = vmul.f32 0.4794383, %v953_v49  ;;  %v299_v5 = vrot.slane %v953_v49, 7  ;;  %v305_v6 = vrot.slane %v953_v49, 1 }
  0xa3   :  { %v961_v38 = vadd.f32 %v95_v0, %v75_v55  ;;  %v214_v7 = vmul.f32 0.026913157, %v211_v1  ;;  %v320_v8 = vrot.slane %v953_v49, 6  ;;  %v326_v9 = vrot.slane %v953_v49, 2 }
  0xa4   :  { %v216_v10 = vmul.f32 0.026913157, %v213_v3  ;;  %v280_v11 = vsel %vm32_vm0, 0.0, %v275_v45  ;;  %v194_v12 = vmul.f32 0.23336768, %v191_v47  ;;  %v208_v34 = vsel %vm87_vm6, %v206_v54, %v207_v41 }
  0xa5   :  { %111 = vrot.lane.b32.xlu0 %v961_v38, %s801_s21  ;;  %105 = vrot.lane.b32.xlu1 %v961_v38, %s800_s0  ;;  %v974_v16 = vadd.f32 %v214_v7, %v196_v63  ;;  %v282_v17 = vsel %vm35_vm1, %v280_v11, 0.0  ;;  %v212_v18 = vadd.f32 %v208_v34, %v203_v37  ;;  %v979_v26 = vsel %vm35_vm1, %v871_v44, 0.0 }
  0xa6   :  { %v981_v20 = vadd.f32 %v216_v10, %v198_v2  ;;  %v286_v41 = vrot.slane %v282_v17, 6  ;;  %v197_v22 = vadd.f32 %v194_v12, %v907_v25  ;;  %v406_v23 = vrot.slane %v979_v26, 6 }
  0xa7   :  { %v215_v24 = vmul.f32 0.026913157, %v212_v18  ;;  %v399_v28 = vsel %vm32_vm0, 0.0, %v394_v62  ;;  %v519_v29 = vsel %vm32_vm0, 0.0, %v515_v13  ;;  %v518_v31 = vsel %vm32_vm0, 0.0, %v513_v15 }
  0xa8   :  { %v288_v33 = vsel %vm40_vm2, %v286_v41, %v287_v48  ;;  %v292_v44 = vsel %vm40_vm2, 0.0, %v286_v41  ;;  %v993_v32 = vsel %vm40_vm2, %v406_v23, 0.0  ;;  %v401_v25 = vsel %vm35_vm1, %v399_v28, 0.0 }
  0xa9   :  { %124 = vrot.lane.b32.xlu0 %v909_v30, %s799_s20  ;;  %109 = vrot.lane.b32.xlu1 %v909_v30, %s801_s21  ;;  %v294_v19 = vmul.f32 0.4794383, %v292_v44  ;;  %v295_v21 = vmul.f32 0.4794383, %v288_v33  ;;  %v297_v27 = vrot.slane %v292_v44, 7  ;;  %v298_v35 = vrot.slane %v288_v33, 7 }
  0xaa   :  { %v303_v43 = vrot.slane %v292_v44, 1  ;;  %v304_v40 = vrot.slane %v288_v33, 1  ;;  %v318_v48 = vrot.slane %v292_v44, 6  ;;  %v319_v42 = vrot.slane %v288_v33, 6 }
  0xab   :  { %v300_v36 = vsel %vm57_vm3, %v298_v35, %v299_v5  ;;  %v301_v45 = vsel %vm57_vm3, %v297_v27, %v298_v35  ;;  %v302_v46 = vsel %vm57_vm3, %v299_v5, %v297_v27  ;;  %v324_v47 = vrot.slane %v292_v44, 2 }
  0xac   :  { %v306_v50 = vsel %vm64_vm4, %v304_v40, %v305_v6  ;;  %v307_v51 = vsel %vm64_vm4, %v303_v43, %v304_v40  ;;  %v308_v52 = vsel %vm64_vm4, %v305_v6, %v303_v43  ;;  %v1014_v53 = vsel %vm80_vm5, %v318_v48, %v319_v42 }
  0xad   :  { %128 = vrot.lane.b32.xlu0 %v919_v39, %s799_s20  ;;  %113 = vrot.lane.b32.xlu1 %v919_v39, %s801_s21  ;;  %v309_v54 = vadd.f32 %v307_v51, %v302_v46  ;;  %v310_v55 = vadd.f32 %v306_v50, %v301_v45  ;;  %v311_v56 = vadd.f32 %v308_v52, %v300_v36  ;;  %v325_v37 = vrot.slane %v288_v33, 2 }
  0xae   :  { %v323_v57 = vsel %vm80_vm5, %v320_v8, %v318_v48  ;;  %v329_v58 = vsel %vm87_vm6, %v326_v9, %v324_v47  ;;  %v1026_v59 = vadd.f32 %v215_v24, %v197_v22  ;;  %v321_v60 = vsel %vm80_vm5, %v319_v42, %v320_v8 }
  0xaf   :  { %v312_v61 = vmul.f32 0.23336768, %v309_v54  ;;  %v328_v62 = vsel %vm87_vm6, %v324_v47, %v325_v37  ;;  %v314_v63 = vmul.f32 0.23336768, %v311_v56  ;;  %v332_v0 = vadd.f32 %v329_v58, %v321_v60 }
  0xb0   :  { %v330_v1 = vadd.f32 %v328_v62, %v323_v57  ;;  %v1033_v2 = vmul.f32 0.4794383, %v993_v32  ;;  %v418_v3 = vrot.slane %v993_v32, 7  ;;  %v424_v5 = vrot.slane %v993_v32, 1 }
  0xb1   :  { %132 = vrot.lane.b32.xlu0 %v961_v38, %s802_s22  ;;  %126 = vrot.lane.b32.xlu1 %v961_v38, %s799_s20  ;;  %v315_v6 = vadd.f32 %v312_v61, %v294_v19  ;;  %v317_v7 = vadd.f32 %v314_v63, %v957_v4  ;;  %v335_v8 = vmul.f32 0.026913157, %v332_v0  ;;  %v439_v10 = vrot.slane %v993_v32, 6 }
  0xb2   :  { %v333_v11 = vmul.f32 0.026913157, %v330_v1  ;;  %v445_v12 = vrot.slane %v993_v32, 2  ;;  %v405_v34 = vrot.slane %v401_v25, 6  ;;  %v313_v13 = vmul.f32 0.23336768, %v310_v55 }
  0xb3   :  { %v1044_v15 = vadd.f32 %v335_v8, %v317_v7  ;;  %v327_v17 = vsel %vm87_vm6, %v325_v37, %v326_v9  ;;  %v521_v18 = vsel %vm35_vm1, %v519_v29, 0.0  ;;  %v520_v26 = vsel %vm35_vm1, %v518_v31, 0.0 }
  0xb4   :  { %v1052_v4 = vadd.f32 %v333_v11, %v315_v6  ;;  %v1055_v41 = vsel %vm40_vm2, %v405_v34, %v406_v23  ;;  %v411_v22 = vsel %vm40_vm2, 0.0, %v405_v34  ;;  %v316_v24 = vadd.f32 %v313_v13, %v295_v21 }
  0xb5   :  { %130 = vrot.lane.b32.xlu1 %v909_v30, %s802_s22  ;;  %223 = vrot.lane.b32.xlu0 %v974_v16, %s800_s0  ;;  %v413_v49 = vmul.f32 0.4794383, %v411_v22  ;;  %v1063_v9 = vmul.f32 0.4794383, %v1055_v41  ;;  %v416_v28 = vrot.slane %v411_v22, 7  ;;  %v417_v29 = vrot.slane %v1055_v41, 7 }
  0xb6   :  { %v422_v31 = vrot.slane %v411_v22, 1  ;;  %v423_v23 = vrot.slane %v1055_v41, 1  ;;  %v437_v33 = vrot.slane %v411_v22, 6  ;;  %v438_v44 = vrot.slane %v1055_v41, 6 }
  0xb7   :  { %v419_v25 = vsel %vm57_vm3, %v417_v29, %v418_v3  ;;  %v420_v19 = vsel %vm57_vm3, %v416_v28, %v417_v29  ;;  %v421_v21 = vsel %vm57_vm3, %v418_v3, %v416_v28  ;;  %v443_v27 = vrot.slane %v411_v22, 2 }
  0xb8   :  { %v425_v35 = vsel %vm64_vm4, %v423_v23, %v424_v5  ;;  %v426_v43 = vsel %vm64_vm4, %v422_v31, %v423_v23  ;;  %v427_v40 = vsel %vm64_vm4, %v424_v5, %v422_v31  ;;  %v1082_v48 = vsel %vm80_vm5, %v437_v33, %v438_v44 }
  0xb9   :  { %134 = vrot.lane.b32.xlu1 %v919_v39, %s802_s22  ;;  %227 = vrot.lane.b32.xlu0 %v981_v20, %s800_s0  ;;  %v428_v42 = vadd.f32 %v426_v43, %v421_v21  ;;  %v1088_v36 = vadd.f32 %v425_v35, %v420_v19  ;;  %v430_v45 = vadd.f32 %v427_v40, %v419_v25  ;;  %v444_v46 = vrot.slane %v1055_v41, 2 }
  0xba   :  { %v442_v47 = vsel %vm80_vm5, %v439_v10, %v437_v33  ;;  %v448_v50 = vsel %vm87_vm6, %v445_v12, %v443_v27  ;;  %v331_v51 = vadd.f32 %v327_v17, %v1014_v53  ;;  %v525_v52 = vrot.slane %v521_v18, 6  ;;  %v634_v33 = vpop.permute.xlu1 %633 }
  0xbb   :  { %v431_v54 = vmul.f32 0.23336768, %v428_v42  ;;  %v447_v55 = vsel %vm87_vm6, %v443_v27, %v444_v46  ;;  %v524_v56 = vrot.slane %v520_v26, 6  ;;  %v433_v37 = vmul.f32 0.23336768, %v430_v45  ;;  %v632_v27 = vpop.permute.xlu0 %631 }
  0xbc   :  { %v334_v57 = vmul.f32 0.026913157, %v331_v51  ;;  %v1103_v58 = vsel %vm40_vm2, %v525_v52, 0.0  ;;  %v449_v60 = vadd.f32 %v447_v55, %v442_v47  ;;  %v440_v61 = vsel %vm80_vm5, %v438_v44, %v439_v10 }
  0xbd   :  { %231 = vrot.lane.b32.xlu0 %v1026_v59, %s801_s21  ;;  %225 = vrot.lane.b32.xlu1 %v1026_v59, %s800_s0  ;;  %v434_v53 = vadd.f32 %v431_v54, %v413_v49  ;;  %v1112_v62 = vmul.f32 0.4794383, %v1103_v58  ;;  %v537_v63 = vrot.slane %v1103_v58, 7  ;;  %v543_v0 = vrot.slane %v1103_v58, 1 }
  0xbe   :  { %v1116_v1 = vadd.f32 %v334_v57, %v316_v24  ;;  %v558_v3 = vrot.slane %v1103_v58, 6  ;;  %v564_v5 = vrot.slane %v1103_v58, 2  ;;  %v1121_v6 = vsel %vm40_vm2, %v524_v56, %v525_v52 }
  0xbf   :  { %v530_v7 = vsel %vm40_vm2, 0.0, %v524_v56  ;;  %v1125_v8 = vmul.f32 0.4794383, %v1121_v6  ;;  %v536_v10 = vrot.slane %v1121_v6, 7  ;;  %v542_v11 = vrot.slane %v1121_v6, 1 }
  0xc0   :  { %v532_v34 = vmul.f32 0.4794383, %v530_v7  ;;  %v535_v13 = vrot.slane %v530_v7, 7  ;;  %v541_v17 = vrot.slane %v530_v7, 1  ;;  %v556_v18 = vrot.slane %v530_v7, 6 }
  0xc1   :  { %244 = vrot.lane.b32.xlu0 %v974_v16, %s799_s20  ;;  %229 = vrot.lane.b32.xlu1 %v974_v16, %s801_s21  ;;  %v538_v26 = vsel %vm57_vm3, %v536_v10, %v537_v63  ;;  %v544_v22 = vsel %vm64_vm4, %v542_v11, %v543_v0  ;;  %v557_v24 = vrot.slane %v1121_v6, 6  ;;  %v562_v49 = vrot.slane %v530_v7, 2 }
  0xc2   :  { %v539_v28 = vsel %vm57_vm3, %v535_v13, %v536_v10  ;;  %v540_v29 = vsel %vm57_vm3, %v537_v63, %v535_v13  ;;  %v545_v31 = vsel %vm64_vm4, %v541_v17, %v542_v11  ;;  %v546_v23 = vsel %vm64_vm4, %v543_v0, %v541_v17 }
  0xc3   :  { %v547_v44 = vadd.f32 %v545_v31, %v540_v29  ;;  %v1146_v25 = vadd.f32 %v544_v22, %v539_v28  ;;  %v549_v19 = vadd.f32 %v546_v23, %v538_v26  ;;  %v1152_v21 = vsel %vm80_vm5, %v556_v18, %v557_v24 }
  0xc4   :  { %v561_v35 = vsel %vm80_vm5, %v558_v3, %v556_v18  ;;  %v563_v43 = vrot.slane %v1121_v6, 2  ;;  %v1163_v40 = vsel %vm87_vm6, %v564_v5, %v562_v49  ;;  %v452_v42 = vmul.f32 0.026913157, %v449_v60 }
  0xc5   :  { %248 = vrot.lane.b32.xlu0 %v981_v20, %s799_s20  ;;  %233 = vrot.lane.b32.xlu1 %v981_v20, %s801_s21  ;;  %v550_v45 = vmul.f32 0.23336768, %v547_v44  ;;  %v436_v47 = vadd.f32 %v433_v37, %v1033_v2  ;;  %v451_v51 = vadd.f32 %v448_v50, %v440_v61  ;;  %v638_v52 = vsel %vm32_vm0, 0.0, %v634_v33 }
  0xc6   :  { %v566_v54 = vsel %vm87_vm6, %v562_v49, %v563_v43  ;;  %v1175_v55 = vadd.f32 %v452_v42, %v434_v53  ;;  %v640_v56 = vsel %vm35_vm1, %v638_v52, 0.0  ;;  %v637_v57 = vsel %vm32_vm0, 0.0, %v632_v27 }
  0xc7   :  { %v553_v60 = vadd.f32 %v550_v45, %v532_v34  ;;  %v454_v63 = vmul.f32 0.026913157, %v451_v51  ;;  %v644_v0 = vrot.slane %v640_v56, 6  ;;  %v639_v7 = vsel %vm35_vm1, %v637_v57, 0.0 }
  0xc8   :  { %v643_v2 = vrot.slane %v639_v7, 6  ;;  %v432_v50 = vmul.f32 0.23336768, %v1088_v36  ;;  %v446_v37 = vsel %vm87_vm6, %v444_v46, %v445_v12  ;;  %v568_v61 = vadd.f32 %v566_v54, %v561_v35 }
  0xc9   :  { %252 = vrot.lane.b32.xlu0 %v1026_v59, %s802_s22  ;;  %246 = vrot.lane.b32.xlu1 %v1026_v59, %s799_s20  ;;  %v1191_v53 = vadd.f32 %v454_v63, %v436_v47  ;;  %v650_v10 = vsel %vm40_vm2, %v644_v0, 0.0  ;;  %v450_v36 = vadd.f32 %v446_v37, %v1082_v48  ;;  %v552_v11 = vmul.f32 0.23336768, %v549_v19 }
  0xca   :  { %v653_v32 = vmul.f32 0.4794383, %v650_v10  ;;  %v656_v34 = vrot.slane %v650_v10, 7  ;;  %v662_v41 = vrot.slane %v650_v10, 1  ;;  %v677_v13 = vrot.slane %v650_v10, 6 }
  0xcb   :  { %v683_v17 = vrot.slane %v650_v10, 2  ;;  %v645_v12 = vsel %vm40_vm2, %v643_v2, %v644_v0  ;;  %v649_v46 = vsel %vm40_vm2, 0.0, %v643_v2  ;;  %v435_v18 = vadd.f32 %v432_v50, %v1063_v9 }
  0xcc   :  { %v651_v26 = vmul.f32 0.4794383, %v649_v46  ;;  %v652_v22 = vmul.f32 0.4794383, %v645_v12  ;;  %v654_v49 = vrot.slane %v649_v46, 7  ;;  %v655_v28 = vrot.slane %v645_v12, 7 }
  0xcd   :  { %250 = vrot.lane.b32.xlu1 %v974_v16, %s802_s22  ;;  %342 = vrot.lane.b32.xlu0 %v1052_v4, %s800_s0  ;;  %v660_v48 = vrot.slane %v649_v46, 1  ;;  %v661_v29 = vrot.slane %v645_v12, 1  ;;  %v675_v31 = vrot.slane %v649_v46, 6  ;;  %v676_v23 = vrot.slane %v645_v12, 6 }
  0xce   :  { %v657_v33 = vsel %vm57_vm3, %v655_v28, %v656_v34  ;;  %v658_v9 = vsel %vm57_vm3, %v654_v49, %v655_v28  ;;  %v659_v44 = vsel %vm57_vm3, %v656_v34, %v654_v49  ;;  %v681_v19 = vrot.slane %v649_v46, 2 }
  0xcf   :  { %v663_v27 = vsel %vm64_vm4, %v661_v29, %v662_v41  ;;  %v664_v35 = vsel %vm64_vm4, %v660_v48, %v661_v29  ;;  %v665_v42 = vsel %vm64_vm4, %v662_v41, %v660_v48  ;;  %v679_v45 = vsel %vm80_vm5, %v675_v31, %v676_v23 }
  0xd0   :  { %v666_v47 = vadd.f32 %v664_v35, %v659_v44  ;;  %v667_v51 = vadd.f32 %v663_v27, %v658_v9  ;;  %v668_v52 = vadd.f32 %v665_v42, %v657_v33  ;;  %v680_v54 = vsel %vm80_vm5, %v677_v13, %v675_v31 }
  0xd1   :  { %254 = vrot.lane.b32.xlu1 %v981_v20, %s802_s22  ;;  %346 = vrot.lane.b32.xlu0 %v1044_v15, %s800_s0  ;;  %v682_v56 = vrot.slane %v645_v12, 2  ;;  %v686_v57 = vsel %vm87_vm6, %v683_v17, %v681_v19  ;;  %v453_v63 = vmul.f32 0.026913157, %v450_v36  ;;  %v571_v0 = vmul.f32 0.026913157, %v568_v61 }
  0xd2   :  { %v669_v7 = vmul.f32 0.23336768, %v666_v47  ;;  %v555_v2 = vadd.f32 %v552_v11, %v1112_v62  ;;  %v559_v50 = vsel %vm80_vm5, %v557_v24, %v558_v3  ;;  %v551_v37 = vmul.f32 0.23336768, %v1146_v25 }
  0xd3   :  { %v685_v10 = vsel %vm87_vm6, %v681_v19, %v682_v56  ;;  %v1234_v34 = vadd.f32 %v453_v63, %v435_v18  ;;  %v1236_v41 = vadd.f32 %v571_v0, %v553_v60  ;;  %v570_v61 = vadd.f32 %v1163_v40, %v559_v50 }
  0xd4   :  { %v672_v36 = vadd.f32 %v669_v7, %v651_v26  ;;  %v554_v62 = vadd.f32 %v551_v37, %v1125_v8  ;;  %v565_v3 = vsel %vm87_vm6, %v563_v43, %v564_v5  ;;  %v687_v24 = vadd.f32 %v685_v10, %v680_v54 }
  0xd5   :  { %350 = vrot.lane.b32.xlu0 %v1116_v1, %s801_s21  ;;  %344 = vrot.lane.b32.xlu1 %v1116_v1, %s800_s0  ;;  %v573_v25 = vmul.f32 0.026913157, %v570_v61  ;;  %v569_v40 = vadd.f32 %v565_v3, %v1152_v21  ;;  %v671_v60 = vmul.f32 0.23336768, %v668_v52  ;;  %v678_v8 = vsel %vm80_vm5, %v676_v23, %v677_v13 }
  0xd6   :  { %v690_v58 = vmul.f32 0.026913157, %v687_v24  ;;  %v689_v11 = vadd.f32 %v686_v57, %v678_v8  ;;  %v670_v6 = vmul.f32 0.23336768, %v667_v51  ;;  %v684_v5 = vsel %vm87_vm6, %v682_v56, %v683_v17 }
  0xd7   :  { %v1255_v43 = vadd.f32 %v573_v25, %v555_v2  ;;  %v572_v12 = vmul.f32 0.026913157, %v569_v40  ;;  %v674_v46 = vadd.f32 %v671_v60, %v653_v32  ;;  %v688_v18 = vadd.f32 %v684_v5, %v679_v45 }
  0xd8   :  { %v1257_v26 = vadd.f32 %v690_v58, %v672_v36  ;;  %v692_v49 = vmul.f32 0.026913157, %v689_v11  ;;  %v673_v28 = vadd.f32 %v670_v6, %v652_v22  ;;  %v101_v45 = vmul.f32 0.4794383, %v961_v38 }
  0xd9   :  { %363 = vrot.lane.b32.xlu0 %v1052_v4, %s799_s20  ;;  %348 = vrot.lane.b32.xlu1 %v1052_v4, %s801_s21  ;;  %v1263_v21 = vadd.f32 %v572_v12, %v554_v62  ;;  %v691_v13 = vmul.f32 0.026913157, %v688_v18  ;;  %v100_v0 = vmul.f32 0.4794383, %v909_v30  ;;  %v102_v30 = vmul.f32 0.4794383, %v919_v39 }
  0xda   :  { %v1265_v14 = vadd.f32 %v692_v49, %v674_v46  ;;  %v221_v49 = vmul.f32 0.4794383, %v1026_v59 }
  0xdb   :  { %v1267_v17 = vadd.f32 %v691_v13, %v673_v28 }
  0xdd   :  { %367 = vrot.lane.b32.xlu0 %v1044_v15, %s799_s20  ;;  %352 = vrot.lane.b32.xlu1 %v1044_v15, %s801_s21 }
  0xe1   :  { %371 = vrot.lane.b32.xlu0 %v1116_v1, %s802_s22  ;;  %365 = vrot.lane.b32.xlu1 %v1116_v1, %s799_s20 }
  0xe5   :  { %369 = vrot.lane.b32.xlu1 %v1052_v4, %s802_s22  ;;  %461 = vrot.lane.b32.xlu0 %v1175_v55, %s800_s0 }
  0xe9   :  { %373 = vrot.lane.b32.xlu1 %v1044_v15, %s802_s22  ;;  %465 = vrot.lane.b32.xlu0 %v1191_v53, %s800_s0 }
  0xed   :  { %469 = vrot.lane.b32.xlu0 %v1234_v34, %s801_s21  ;;  %463 = vrot.lane.b32.xlu1 %v1234_v34, %s800_s0 }
  0xf1   :  { %467 = vrot.lane.b32.xlu1 %v1175_v55, %s801_s21  ;;  %580 = vrot.lane.b32.xlu0 %v1236_v41, %s800_s0 }
  0xf5   :  { %471 = vrot.lane.b32.xlu1 %v1191_v53, %s801_s21  ;;  %584 = vrot.lane.b32.xlu0 %v1255_v43, %s800_s0 }
  0xf9   :  { %588 = vrot.lane.b32.xlu0 %v1263_v21, %s801_s21  ;;  %582 = vrot.lane.b32.xlu1 %v1263_v21, %s800_s0 }
  0xfd   :  { %586 = vrot.lane.b32.xlu1 %v1236_v41, %s801_s21  ;;  %699 = vrot.lane.b32.xlu0 %v1257_v26, %s800_s0 }
 0x101   :  { %590 = vrot.lane.b32.xlu1 %v1255_v43, %s801_s21  ;;  %703 = vrot.lane.b32.xlu0 %v1265_v14, %s800_s0 }
 0x105   :  { %707 = vrot.lane.b32.xlu0 %v1267_v17, %s801_s21  ;;  %701 = vrot.lane.b32.xlu1 %v1267_v17, %s800_s0 }
 0x109   :  { %482 = vrot.lane.b32.xlu0 %v1175_v55, %s799_s20  ;;  %705 = vrot.lane.b32.xlu1 %v1257_v26, %s801_s21 }
 0x10d   :  { %486 = vrot.lane.b32.xlu0 %v1191_v53, %s799_s20  ;;  %709 = vrot.lane.b32.xlu1 %v1265_v14, %s801_s21 }
 0x10e   :  { %v104_v32 = vpop.permute.xlu1 %103 }
 0x110   :  { %v108_v22 = vpop.permute.xlu0 %107 }
 0x111   :  { %490 = vrot.lane.b32.xlu0 %v1234_v34, %s802_s22  ;;  %484 = vrot.lane.b32.xlu1 %v1234_v34, %s799_s20 }
 0x115   :  { %601 = vrot.lane.b32.xlu0 %v1236_v41, %s799_s20  ;;  %488 = vrot.lane.b32.xlu1 %v1175_v55, %s802_s22 }
 0x117   :  { %v106_v48 = vpop.permute.xlu1 %105  ;;  %v112_v29 = vpop.permute.xlu0 %111 }
 0x118   :  { %v116_v33 = vadd.f32 %v112_v29, %v106_v48 }
 0x119   :  { %605 = vrot.lane.b32.xlu0 %v1255_v43, %s799_s20  ;;  %492 = vrot.lane.b32.xlu1 %v1191_v53, %s802_s22 }
 0x11a   :  { %v119_v19 = vmul.f32 0.23336768, %v116_v33 }
 0x11b   :  { %v110_v31 = vpop.permute.xlu1 %109  ;;  %v125_v23 = vpop.permute.xlu0 %124 }
 0x11c   :  { %v115_v27 = vadd.f32 %v110_v31, %v104_v32  ;;  %v122_v51 = vadd.f32 %v119_v19, %v101_v45 }
 0x11d   :  { %609 = vrot.lane.b32.xlu0 %v1263_v21, %s802_s22  ;;  %603 = vrot.lane.b32.xlu1 %v1263_v21, %s799_s20 }
 0x11e   :  { %v118_v52 = vmul.f32 0.23336768, %v115_v27 }
 0x11f   :  { %v114_v9 = vpop.permute.xlu1 %113  ;;  %v129_v44 = vpop.permute.xlu0 %128 }
 0x120   :  { %v117_v54 = vadd.f32 %v114_v9, %v108_v22  ;;  %v121_v38 = vadd.f32 %v118_v52, %v100_v0 }
 0x121   :  { %720 = vrot.lane.b32.xlu0 %v1257_v26, %s799_s20  ;;  %607 = vrot.lane.b32.xlu1 %v1236_v41, %s802_s22 }
 0x122   :  { %v120_v50 = vmul.f32 0.23336768, %v117_v54 }
 0x123   :  { %v127_v35 = vpop.permute.xlu1 %126  ;;  %v133_v42 = vpop.permute.xlu0 %132 }
 0x124   :  { %v137_v47 = vadd.f32 %v133_v42, %v127_v35  ;;  %v123_v3 = vadd.f32 %v120_v50, %v102_v30  ;;  %v222_v42 = vmul.f32 0.4794383, %v981_v20 }
 0x125   :  { %724 = vrot.lane.b32.xlu0 %v1265_v14, %s799_s20  ;;  %611 = vrot.lane.b32.xlu1 %v1255_v43, %s802_s22 }
 0x126   :  { %v140_v56 = vmul.f32 0.026913157, %v137_v47 }
 0x127   :  { %v131_v57 = vpop.permute.xlu1 %130  ;;  %v224_v63 = vpop.permute.xlu0 %223 }
 0x128   :  { %v143_v7 = vadd.f32 %v140_v56, %v122_v51  ;;  %v136_v2 = vadd.f32 %v131_v57, %v125_v23  ;;  %v220_v23 = vmul.f32 0.4794383, %v974_v16 }
 0x129   :  { %728 = vrot.lane.b32.xlu0 %v1267_v17, %s802_s22  ;;  %722 = vrot.lane.b32.xlu1 %v1267_v17, %s799_s20 }
 0x12a   :  { %147 = vst.msk [vmem:[%s1453_s1 + $0x8] sm:$0xff] %vm145_vm7, %v143_v7  ;;  %v139_v37 = vmul.f32 0.026913157, %v136_v2 }
 0x12b   :  { %v135_v10 = vpop.permute.xlu1 %134  ;;  %v228_v61 = vpop.permute.xlu0 %227 }
 0x12c   :  { %v142_v36 = vadd.f32 %v139_v37, %v121_v38  ;;  %v138_v62 = vadd.f32 %v135_v10, %v129_v44  ;;  %v340_v10 = vmul.f32 0.4794383, %v1116_v1 }
 0x12d   :  { %726 = vrot.lane.b32.xlu1 %v1257_v26, %s802_s22 }
 0x12e   :  { %146 = vst.msk [vmem:[%s1453_s1] sm:$0xff] %vm145_vm7, %v142_v36  ;;  %v141_v24 = vmul.f32 0.026913157, %v138_v62 }
 0x12f   :  { %v226_v25 = vpop.permute.xlu1 %225  ;;  %v232_v40 = vpop.permute.xlu0 %231 }
 0x130   :  { %v144_v60 = vadd.f32 %v141_v24, %v123_v3  ;;  %v236_v58 = vadd.f32 %v232_v40, %v226_v25  ;;  %v339_v40 = vmul.f32 0.4794383, %v1052_v4 }
 0x131   :  { %730 = vrot.lane.b32.xlu1 %v1265_v14, %s802_s22 }
 0x132   :  { %149 = vst.msk [vmem:[%s1453_s1 + $0x10] sm:$0xf] %vm148_vm8, %v144_v60  ;;  %v239_v5 = vmul.f32 0.23336768, %v236_v58 }
 0x133   :  { %v230_v39 = vpop.permute.xlu1 %229  ;;  %v245_v8 = vpop.permute.xlu0 %244 }
 0x134   :  { %v235_v12 = vadd.f32 %v230_v39, %v224_v63  ;;  %v242_v13 = vadd.f32 %v239_v5, %v221_v49  ;;  %v341_v5 = vmul.f32 0.4794383, %v1044_v15 }
 0x136   :  { %v238_v32 = vmul.f32 0.23336768, %v235_v12 }
 0x137   :  { %v234_v11 = vpop.permute.xlu1 %233  ;;  %v249_v6 = vpop.permute.xlu0 %248 }
 0x138   :  { %v237_v22 = vadd.f32 %v234_v11, %v228_v61  ;;  %v241_v44 = vadd.f32 %v238_v32, %v220_v23 }
 0x13a   :  { %v240_v19 = vmul.f32 0.23336768, %v237_v22 }
 0x13b   :  { %v247_v46 = vpop.permute.xlu1 %246  ;;  %v253_v18 = vpop.permute.xlu0 %252 }
 0x13c   :  { %v257_v28 = vadd.f32 %v253_v18, %v247_v46  ;;  %v243_v51 = vadd.f32 %v240_v19, %v222_v42 }
 0x13e   :  { %v260_v48 = vmul.f32 0.026913157, %v257_v28 }
 0x13f   :  { %v251_v29 = vpop.permute.xlu1 %250  ;;  %v343_v31 = vpop.permute.xlu0 %342 }
 0x140   :  { %v263_v33 = vadd.f32 %v260_v48, %v242_v13  ;;  %v256_v9 = vadd.f32 %v251_v29, %v245_v8 }
 0x142   :  { %751 = vst.msk [vmem:[%s1453_s1 + $0x20] sm:$0xff] %vm145_vm7, %v263_v33  ;;  %v259_v27 = vmul.f32 0.026913157, %v256_v9 }
 0x143   :  { %v255_v59 = vpop.permute.xlu1 %254  ;;  %v347_v35 = vpop.permute.xlu0 %346 }
 0x144   :  { %v262_v45 = vadd.f32 %v259_v27, %v241_v44  ;;  %v258_v47 = vadd.f32 %v255_v59, %v249_v6 }
 0x146   :  { %750 = vst.msk [vmem:[%s1453_s1 + $0x18] sm:$0xff] %vm145_vm7, %v262_v45  ;;  %v261_v16 = vmul.f32 0.026913157, %v258_v47 }
 0x147   :  { %v345_v52 = vpop.permute.xlu1 %344  ;;  %v351_v54 = vpop.permute.xlu0 %350 }
 0x148   :  { %v264_v56 = vadd.f32 %v261_v16, %v243_v51  ;;  %v355_v20 = vadd.f32 %v351_v54, %v345_v52 }
 0x14a   :  { %752 = vst.msk [vmem:[%s1453_s1 + $0x28] sm:$0xf] %vm148_vm8, %v264_v56  ;;  %v358_v2 = vmul.f32 0.23336768, %v355_v20  ;;  %v459_v56 = vmul.f32 0.4794383, %v1234_v34 }
 0x14b   :  { %v349_v57 = vpop.permute.xlu1 %348  ;;  %v364_v63 = vpop.permute.xlu0 %363 }
 0x14c   :  { %v354_v38 = vadd.f32 %v349_v57, %v343_v31  ;;  %v361_v30 = vadd.f32 %v358_v2, %v340_v10 }
 0x14e   :  { %v357_v36 = vmul.f32 0.23336768, %v354_v38 }
 0x14f   :  { %v353_v0 = vpop.permute.xlu1 %352  ;;  %v368_v7 = vpop.permute.xlu0 %367 }
 0x150   :  { %v356_v62 = vadd.f32 %v353_v0, %v347_v35  ;;  %v360_v8 = vadd.f32 %v357_v36, %v339_v40 }
 0x152   :  { %v359_v58 = vmul.f32 0.23336768, %v356_v62 }
 0x153   :  { %v366_v50 = vpop.permute.xlu1 %365  ;;  %v372_v37 = vpop.permute.xlu0 %371 }
 0x154   :  { %v376_v61 = vadd.f32 %v372_v37, %v366_v50  ;;  %v362_v18 = vadd.f32 %v359_v58, %v341_v5  ;;  %v458_v50 = vmul.f32 0.4794383, %v1175_v55 }
 0x156   :  { %v379_v3 = vmul.f32 0.026913157, %v376_v61 }
 0x157   :  { %v370_v24 = vpop.permute.xlu1 %369  ;;  %v462_v25 = vpop.permute.xlu0 %461 }
 0x158   :  { %v382_v60 = vadd.f32 %v379_v3, %v361_v30  ;;  %v375_v39 = vadd.f32 %v370_v24, %v364_v63  ;;  %v460_v24 = vmul.f32 0.4794383, %v1191_v53 }
 0x15a   :  { %754 = vst.msk [vmem:[%s1453_s1 + $0x38] sm:$0xff] %vm145_vm7, %v382_v60  ;;  %v378_v11 = vmul.f32 0.026913157, %v375_v39 }
 0x15b   :  { %v374_v1 = vpop.permute.xlu1 %373  ;;  %v466_v6 = vpop.permute.xlu0 %465 }
 0x15c   :  { %v381_v12 = vadd.f32 %v378_v11, %v360_v8  ;;  %v377_v46 = vadd.f32 %v374_v1, %v368_v7  ;;  %v578_v1 = vmul.f32 0.4794383, %v1263_v21 }
 0x15e   :  { %753 = vst.msk [vmem:[%s1453_s1 + $0x30] sm:$0xff] %vm145_vm7, %v381_v12  ;;  %v380_v4 = vmul.f32 0.026913157, %v377_v46 }
 0x15f   :  { %v464_v49 = vpop.permute.xlu1 %463  ;;  %v470_v28 = vpop.permute.xlu0 %469 }
 0x160   :  { %v383_v13 = vadd.f32 %v380_v4, %v362_v18  ;;  %v474_v42 = vadd.f32 %v470_v28, %v464_v49  ;;  %v577_v28 = vmul.f32 0.4794383, %v1236_v41 }
 0x162   :  { %755 = vst.msk [vmem:[%s1453_s1 + $0x40] sm:$0xf] %vm148_vm8, %v383_v13  ;;  %v477_v51 = vmul.f32 0.23336768, %v474_v42 }
 0x163   :  { %v468_v32 = vpop.permute.xlu1 %467  ;;  %v581_v22 = vpop.permute.xlu0 %580 }
 0x164   :  { %v473_v16 = vadd.f32 %v468_v32, %v462_v25  ;;  %v480_v63 = vadd.f32 %v477_v51, %v459_v56 }
 0x166   :  { %v476_v20 = vmul.f32 0.23336768, %v473_v16  ;;  %v697_v16 = vmul.f32 0.4794383, %v1267_v17 }
 0x167   :  { %v472_v15 = vpop.permute.xlu1 %471  ;;  %v585_v48 = vpop.permute.xlu0 %584 }
 0x168   :  { %v475_v0 = vadd.f32 %v472_v15, %v466_v6  ;;  %v479_v61 = vadd.f32 %v476_v20, %v458_v50 }
 0x16a   :  { %v478_v30 = vmul.f32 0.23336768, %v475_v0 }
 0x16b   :  { %v583_v29 = vpop.permute.xlu1 %582  ;;  %v589_v31 = vpop.permute.xlu0 %588 }
 0x16c   :  { %v593_v36 = vadd.f32 %v589_v31, %v583_v29  ;;  %v481_v60 = vadd.f32 %v478_v30, %v460_v24 }
 0x16e   :  { %v596_v39 = vmul.f32 0.23336768, %v593_v36 }
 0x16f   :  { %v587_v23 = vpop.permute.xlu1 %586  ;;  %v1398_v33 = vpop.permute.xlu0 %699 }
 0x170   :  { %v592_v55 = vadd.f32 %v587_v23, %v581_v22  ;;  %v599_v12 = vadd.f32 %v596_v39, %v578_v1  ;;  %v579_v23 = vmul.f32 0.4794383, %v1255_v43 }
 0x172   :  { %v595_v46 = vmul.f32 0.23336768, %v592_v55 }
 0x173   :  { %v591_v9 = vpop.permute.xlu1 %590  ;;  %v1400_v44 = vpop.permute.xlu0 %703 }
 0x174   :  { %v594_v53 = vadd.f32 %v591_v9, %v585_v48  ;;  %v598_v22 = vadd.f32 %v595_v46, %v577_v28 }
 0x176   :  { %v597_v15 = vmul.f32 0.23336768, %v594_v53 }
 0x177   :  { %v702_v19 = vpop.permute.xlu1 %701  ;;  %v708_v27 = vpop.permute.xlu0 %707 }
 0x178   :  { %v712_v21 = vadd.f32 %v708_v27, %v702_v19  ;;  %v600_v42 = vadd.f32 %v597_v15, %v579_v23 }
 0x17b   :  { %v706_v59 = vpop.permute.xlu1 %705  ;;  %v483_v35 = vpop.permute.xlu0 %482 }
 0x17c   :  { %v711_v41 = vadd.f32 %v706_v59, %v1398_v33 }
 0x17e   :  { %v714_v43 = vmul.f32 0.23336768, %v711_v41 }
 0x17f   :  { %v1402_v45 = vpop.permute.xlu1 %709  ;;  %v487_v47 = vpop.permute.xlu0 %486 }
 0x183   :  { %v485_v52 = vpop.permute.xlu1 %484  ;;  %v491_v54 = vpop.permute.xlu0 %490 }
 0x184   :  { %v495_v57 = vadd.f32 %v491_v54, %v485_v52 }
 0x186   :  { %v498_v7 = vmul.f32 0.026913157, %v495_v57  ;;  %v713_v57 = vadd.f32 %v1402_v45, %v1400_v44  ;;  %v698_v45 = vmul.f32 0.4794383, %v1265_v14 }
 0x187   :  { %v489_v2 = vpop.permute.xlu1 %488  ;;  %v602_v38 = vpop.permute.xlu0 %601 }
 0x188   :  { %v501_v37 = vadd.f32 %v498_v7, %v480_v63  ;;  %v494_v10 = vadd.f32 %v489_v2, %v483_v35  ;;  %v696_v63 = vmul.f32 0.4794383, %v1257_v26  ;;  %v716_v17 = vmul.f32 0.23336768, %v713_v57 }
 0x18a   :  { %757 = vst.msk [vmem:[%s1453_s1 + $0x50] sm:$0xff] %vm145_vm7, %v501_v37  ;;  %v497_v34 = vmul.f32 0.026913157, %v494_v10  ;;  %v717_v7 = vadd.f32 %v714_v43, %v696_v63  ;;  %v719_v37 = vadd.f32 %v716_v17, %v698_v45 }
 0x18b   :  { %v493_v62 = vpop.permute.xlu1 %492  ;;  %v606_v3 = vpop.permute.xlu0 %605 }
 0x18c   :  { %v500_v25 = vadd.f32 %v497_v34, %v479_v61  ;;  %v496_v40 = vadd.f32 %v493_v62, %v487_v47  ;;  %v715_v47 = vmul.f32 0.23336768, %v712_v21 }
 0x18e   :  { %756 = vst.msk [vmem:[%s1453_s1 + $0x48] sm:$0xff] %vm145_vm7, %v500_v25  ;;  %v499_v8 = vmul.f32 0.026913157, %v496_v40  ;;  %v718_v56 = vadd.f32 %v715_v47, %v697_v16 }
 0x18f   :  { %v604_v58 = vpop.permute.xlu1 %603  ;;  %v610_v11 = vpop.permute.xlu0 %609 }
 0x190   :  { %v502_v6 = vadd.f32 %v499_v8, %v481_v60  ;;  %v614_v5 = vadd.f32 %v610_v11, %v604_v58 }
 0x192   :  { %758 = vst.msk [vmem:[%s1453_s1 + $0x58] sm:$0xf] %vm148_vm8, %v502_v6  ;;  %v617_v18 = vmul.f32 0.026913157, %v614_v5 }
 0x193   :  { %v608_v4 = vpop.permute.xlu1 %607  ;;  %v721_v49 = vpop.permute.xlu0 %720 }
 0x194   :  { %v620_v13 = vadd.f32 %v617_v18, %v599_v12  ;;  %v613_v32 = vadd.f32 %v608_v4, %v602_v38 }
 0x196   :  { %760 = vst.msk [vmem:[%s1453_s1 + $0x68] sm:$0xff] %vm145_vm7, %v620_v13  ;;  %v616_v48 = vmul.f32 0.026913157, %v613_v32 }
 0x197   :  { %v612_v29 = vpop.permute.xlu1 %611  ;;  %v725_v31 = vpop.permute.xlu0 %724 }
 0x198   :  { %v619_v9 = vadd.f32 %v616_v48, %v598_v22  ;;  %v615_v35 = vadd.f32 %v612_v29, %v606_v3 }
 0x19a   :  { %759 = vst.msk [vmem:[%s1453_s1 + $0x60] sm:$0xff] %vm145_vm7, %v619_v9  ;;  %v618_v19 = vmul.f32 0.026913157, %v615_v35 }
 0x19b   :  { %v723_v27 = vpop.permute.xlu1 %722  ;;  %v729_v51 = vpop.permute.xlu0 %728 }
 0x19c   :  { %v621_v52 = vadd.f32 %v618_v19, %v600_v42  ;;  %v733_v54 = vadd.f32 %v729_v51, %v723_v27 }
 0x19e   :  { %761 = vst.msk [vmem:[%s1453_s1 + $0x70] sm:$0xf] %vm148_vm8, %v621_v52  ;;  %v736_v33 = vmul.f32 0.026913157, %v733_v54 }
 0x19f   :  { %v727_v59 = vpop.permute.xlu1 %726 }
 0x1a0   :  { %v739_v20 = vadd.f32 %v736_v33, %v718_v56  ;;  %v732_v0 = vadd.f32 %v727_v59, %v721_v49 }
 0x1a2   :  { %763 = vst.msk [vmem:[%s1453_s1 + $0x80] sm:$0xff] %vm145_vm7, %v739_v20  ;;  %v735_v2 = vmul.f32 0.026913157, %v732_v0 }
 0x1a3   :  { %v731_v44 = vpop.permute.xlu1 %730 }
 0x1a4   :  { %v738_v38 = vadd.f32 %v735_v2, %v717_v7  ;;  %v734_v50 = vadd.f32 %v731_v44, %v725_v31 }
 0x1a6   :  { %762 = vst.msk [vmem:[%s1453_s1 + $0x78] sm:$0xff] %vm145_vm7, %v738_v38  ;;  %v737_v26 = vmul.f32 0.026913157, %v734_v50 }
 0x1a8   :  { %v740_v10 = vadd.f32 %v737_v26, %v719_v37 }
 0x1aa   :  { %764 = vst.msk [vmem:[%s1453_s1 + $0x88] sm:$0xf] %vm148_vm8, %v740_v10 }
 0x1ab   :  { %749 = vsyncpa [#allocation3], 1 }

</bundles_post_ra>
